<compile_context>
chip_gen: v6e
topology: v6e:2x2x1
jax: 0.10.0
libtpu: 0.0.40
codegen_flags: <defaults>
</compile_context>

<pallas_src>
import functools
import math

import jax
import jax.numpy as jnp
from jax.experimental import pallas as pl
from jax.experimental.pallas import tpu as pltpu

_EPS = 1e-5
_NORM_EPS = 1e-12
_ACT_DT = jnp.bfloat16          # inter-layer activation dtype


def _pick_tile(m):
    for t in (512, 256, 128, 64, 32, 16, 8):
        if m % t == 0:
            return t
    return m


def _pick_row_tile(ho):
    for th in (32, 16, 8, 4, 2, 1):
        if th <= ho and ho % th == 0:
            return th
    return ho


# ----------------------------------------------------------------------------
# Tiled matmul with fused bias(+ReLU) epilogue and fused BN partial statistics
# ----------------------------------------------------------------------------

def _make_mm_kernel(relu):
    def kernel(x_ref, w_ref, b_ref, o_ref, st_ref):
        y = jnp.dot(x_ref[...].astype(jnp.bfloat16), w_ref[...],
                    preferred_element_type=jnp.float32)
        y = y + b_ref[...]
        # per-tile column sums / sums-of-squares (pre-ReLU) for BatchNorm
        st_ref[0, 0:1, :] = jnp.sum(y, axis=0, keepdims=True)
        st_ref[0, 1:2, :] = jnp.sum(y * y, axis=0, keepdims=True)
        if relu:
            y = jnp.maximum(y, 0.0)
        o_ref[...] = y.astype(o_ref.dtype)
    return kernel


@functools.lru_cache(maxsize=None)
def _build_matmul(m, k, n, tm, relu, out_dtype):
    nt = m // tm
    f = pl.pallas_call(
        _make_mm_kernel(relu),
        grid=(nt,),
        in_specs=[pl.BlockSpec((tm, k), lambda i: (i, 0)),
                  pl.BlockSpec((k, n), lambda i: (0, 0)),
                  pl.BlockSpec((1, n), lambda i: (0, 0))],
        out_specs=(pl.BlockSpec((tm, n), lambda i: (i, 0)),
                   pl.BlockSpec((1, 2, n), lambda i: (i, 0, 0))),
        out_shape=(jax.ShapeDtypeStruct((m, n), out_dtype),
                   jax.ShapeDtypeStruct((nt, 2, n), jnp.float32)),
        compiler_params=pltpu.CompilerParams(dimension_semantics=("parallel",)),
    )
    return jax.jit(f)


def mm_conv(x2d, w2d_bf16, shift, relu=False, out_dtype=_ACT_DT):
    """(M,K)x(K,N) + shift (+ReLU).  Returns (y, (col_sum, col_sumsq, M))."""
    m, k = x2d.shape
    n = w2d_bf16.shape[1]
    fn = _build_matmul(m, k, n, _pick_tile(m), relu, out_dtype)
    y, st = fn(x2d.astype(jnp.bfloat16), w2d_bf16.astype(jnp.bfloat16),
               shift.reshape(1, n).astype(jnp.float32))
    return y, (jnp.sum(st[:, 0, :], axis=0), jnp.sum(st[:, 1, :], axis=0), m)


# ----------------------------------------------------------------------------
# Direct (no-im2col) stride-1 KxK conv: row-slab grid, full tap loop in-kernel
# ----------------------------------------------------------------------------

def _make_dconv_kernel(kh, kw, dil, th, wo, cin, cout, relu):
    def kernel(x_ref, w_ref, b_ref, o_ref, st_ref):
        roff = pl.multiple_of(pl.program_id(1) * th, th)
        acc = None
        for ki in range(kh):
            for kj in range(kw):
                xs = x_ref[0, pl.ds(roff + ki * dil, th), pl.ds(kj * dil, wo), :]
                d = jnp.dot(xs.reshape(th * wo, cin), w_ref[ki, kj],
                            preferred_element_type=jnp.float32)
                acc = d if acc is None else acc + d
        y = acc + b_ref[...]
        st_ref[0, 0, 0:1, :] = jnp.sum(y, axis=0, keepdims=True)
        st_ref[0, 0, 1:2, :] = jnp.sum(y * y, axis=0, keepdims=True)
        if relu:
            y = jnp.maximum(y, 0.0)
        o_ref[0] = y.reshape(th, wo, cout).astype(o_ref.dtype)
    return kernel


@functools.lru_cache(maxsize=None)
def _build_dconv(b, hp, wp, cin, cout, kh, kw, dil, th, ho, wo, relu, out_dtype):
    nt = ho // th
    # The padded input block is the whole image of one batch element; Pallas
    # skips the re-DMA across consecutive row-tiles because the block index is
    # unchanged, so each input byte is read from HBM exactly once.
    f = pl.pallas_call(
        _make_dconv_kernel(kh, kw, dil, th, wo, cin, cout, relu),
        grid=(b, nt),
        in_specs=[
            pl.BlockSpec((1, hp, wp, cin), lambda bi, t: (bi, 0, 0, 0)),
            pl.BlockSpec((kh, kw, cin, cout), lambda bi, t: (0, 0, 0, 0)),
            pl.BlockSpec((1, cout), lambda bi, t: (0, 0)),
        ],
        out_specs=(pl.BlockSpec((1, th, wo, cout), lambda bi, t: (bi, t, 0, 0)),
                   pl.BlockSpec((1, 1, 2, cout), lambda bi, t: (bi, t, 0, 0))),
        out_shape=(jax.ShapeDtypeStruct((b, ho, wo, cout), out_dtype),
                   jax.ShapeDtypeStruct((b, nt, 2, cout), jnp.float32)),
        compiler_params=pltpu.CompilerParams(
            dimension_semantics=("parallel", "arbitrary")),
    )
    return jax.jit(f)


def _conv_direct(x, w_hwio, bias, padding, dilation, relu, out_dtype):
    b, h, w, cin = x.shape
    kh, kw, _, o = w_hwio.shape
    ho = h + 2 * padding - dilation * (kh - 1)
    wo = w + 2 * padding - dilation * (kw - 1)
    opad = o if o >= 128 else 128            # lane-dense stores for 1-ch heads
    wt = w_hwio.astype(jnp.bfloat16)
    if opad != o:
        wt = jnp.pad(wt, ((0, 0), (0, 0), (0, 0), (0, opad - o)))
    shift = jnp.zeros((opad,), jnp.float32)
    if bias is not None:
        shift = shift.at[:o].set(bias.astype(jnp.float32))
    xp = jnp.pad(x.astype(jnp.bfloat16),
                 ((0, 0), (padding, padding), (padding, padding), (0, 0)))
    hp, wp = h + 2 * padding, w + 2 * padding
    th = _pick_row_tile(ho)
    fn = _build_dconv(b, hp, wp, cin, opad, kh, kw, dilation, th, ho, wo,
                      relu, out_dtype)
    y, st = fn(xp, wt, shift.reshape(1, opad))
    s1 = jnp.sum(st[:, :, 0, :o], axis=(0, 1))
    s2 = jnp.sum(st[:, :, 1, :o], axis=(0, 1))
    if opad != o:
        y = y[..., :o]
    return y, (s1, s2, b * ho * wo)


def conv2d(x, w_hwio, bias=None, stride=1, padding=0, dilation=1, relu=False,
           out_dtype=_ACT_DT):
    """NHWC conv.  Weights are HWIO bf16.  Returns (y, (sum, sumsq, count))."""
    kh, kw, cin, o = w_hwio.shape
    b, h, w, _ = x.shape
    if kh == 1 and kw == 1 and stride == 1 and padding == 0:
        shift = bias if bias is not None else jnp.zeros((o,), jnp.float32)
        y, st = mm_conv(x.reshape(-1, cin), w_hwio.reshape(cin, o), shift,
                        relu=relu, out_dtype=out_dtype)
        return y.reshape(b, h, w, o), st
    if kh == kw == stride and padding == 0 and dilation == 1:
        # patch conv (stride == kernel): unfolding is a pure reshape
        ho, wo = h // kh, w // kw
        xr = x.reshape(b, ho, kh, wo, kw, cin).transpose(0, 1, 3, 2, 4, 5)
        xr = xr.reshape(b * ho * wo, kh * kw * cin)
        w2 = w_hwio.reshape(kh * kw * cin, o)
        shift = bias if bias is not None else jnp.zeros((o,), jnp.float32)
        y, st = mm_conv(xr, w2, shift, relu=relu, out_dtype=out_dtype)
        return y.reshape(b, ho, wo, o), st
    assert stride == 1, "direct conv path supports stride 1 only"
    return _conv_direct(x, w_hwio, bias, padding, dilation, relu, out_dtype)


# ----------------------------------------------------------------------------
# Fused elementwise pass: out = act(sum_i scale_i*y_i + shift_i)
# (BatchNorm affine, residual adds and ReLUs all ride on this one kernel.)
# ----------------------------------------------------------------------------

def _make_affine_kernel(n_terms, relu):
    def kernel(*refs):
        o_ref = refs[-1]
        acc = None
        for t in range(n_terms):
            y = refs[3 * t][...].astype(jnp.float32)
            v = y * refs[3 * t + 1][...] + refs[3 * t + 2][...]
            acc = v if acc is None else acc + v
        if relu:
            acc = jnp.maximum(acc, 0.0)
        o_ref[...] = acc.astype(o_ref.dtype)
    return kernel


@functools.lru_cache(maxsize=None)
def _build_affine(m, n, tm, n_terms, relu, out_dtype):
    in_specs = []
    for _ in range(n_terms):
        in_specs += [pl.BlockSpec((tm, n), lambda i: (i, 0)),
                     pl.BlockSpec((1, n), lambda i: (0, 0)),
                     pl.BlockSpec((1, n), lambda i: (0, 0))]
    f = pl.pallas_call(
        _make_affine_kernel(n_terms, relu),
        grid=(m // tm,),
        in_specs=in_specs,
        out_specs=pl.BlockSpec((tm, n), lambda i: (i, 0)),
        out_shape=jax.ShapeDtypeStruct((m, n), out_dtype),
        compiler_params=pltpu.CompilerParams(dimension_semantics=("parallel",)),
    )
    return jax.jit(f)


def affine_terms(terms, relu=False, out_dtype=_ACT_DT):
    """terms: list of (y, scale | None, shift | None); all y channel-last."""
    shp = terms[0][0].shape
    n = shp[-1]
    m = 1
    for d in shp[:-1]:
        m *= d
    args = []
    for y, sc, sh in terms:
        sc = jnp.ones((n,), jnp.float32) if sc is None else sc
        sh = jnp.zeros((n,), jnp.float32) if sh is None else sh
        args += [y.reshape(m, n).astype(jnp.bfloat16),
                 sc.reshape(1, n).astype(jnp.float32),
                 sh.reshape(1, n).astype(jnp.float32)]
    y = _build_affine(m, n, _pick_tile(m), len(terms), relu, out_dtype)(*args)
    return y.reshape(shp)


def _bn_scale_shift(s1, s2, count, gamma, beta):
    inv = 1.0 / float(count)
    mean = s1 * inv
    var = jnp.maximum(s2 * inv - mean * mean, 0.0)
    scale = gamma * jax.lax.rsqrt(var + _EPS)
    return scale, beta - mean * scale


# ----------------------------------------------------------------------------
# Prototype / correlation / attention kernels (per-batch, parallel grid)
# ----------------------------------------------------------------------------

def _make_gp_kernel(axis):
    def kernel(m_ref, x_ref, pb_ref, vis_ref):
        m = m_ref[0].astype(jnp.float32)                    # (Cm, HW)
        m = m - jnp.max(m, axis=axis, keepdims=True)
        e = jnp.exp(m)
        s = e * pl.reciprocal(jnp.sum(e, axis=axis, keepdims=True), approx=True)
        pb_ref[0] = jax.lax.dot_general(
            s.astype(jnp.bfloat16), x_ref[0].astype(jnp.bfloat16),
            (((1,), (1,)), ((), ())), preferred_element_type=jnp.float32)
        vis_ref[0] = s
    return kernel


@functools.lru_cache(maxsize=None)
def _build_gp(b, cm, c, hw, axis):
    f = pl.pallas_call(
        _make_gp_kernel(axis),
        grid=(b,),
        in_specs=[pl.BlockSpec((1, cm, hw), lambda i: (i, 0, 0)),
                  pl.BlockSpec((1, c, hw), lambda i: (i, 0, 0))],
        out_specs=(pl.BlockSpec((1, cm, c), lambda i: (i, 0, 0)),
                   pl.BlockSpec((1, cm, hw), lambda i: (i, 0, 0))),
        out_shape=(jax.ShapeDtypeStruct((b, cm, c), jnp.float32),
                   jax.ShapeDtypeStruct((b, cm, hw), jnp.float32)),
        compiler_params=pltpu.CompilerParams(dimension_semantics=("parallel",)),
    )
    return jax.jit(f)


def get_global_prototypes(target, mask, dim=2):
    """target/mask NHWC.  torch softmax over dim of (b,c,hw): 2=spatial, 1=chan."""
    b, h, w, c = target.shape
    cm = mask.shape[-1]
    hw = h * w
    m = jnp.transpose(mask.reshape(b, hw, cm), (0, 2, 1))
    x = jnp.transpose(target.reshape(b, hw, c), (0, 2, 1))
    axis = 1 if dim == 2 else 0
    pb, vis = _build_gp(b, cm, c, hw, axis)(m, x)
    vis = jnp.transpose(vis, (0, 2, 1)).reshape(b, h, w, cm)
    return pb, vis


def _mask_pool_kernel(m_ref, x_ref, o_ref):
    o_ref[0] = jax.lax.dot_general(
        m_ref[0].astype(jnp.bfloat16), x_ref[0].astype(jnp.bfloat16),
        (((1,), (1,)), ((), ())), preferred_element_type=jnp.float32)


@functools.lru_cache(maxsize=None)
def _build_mask_pool(b, k, c, hw):
    f = pl.pallas_call(
        _mask_pool_kernel,
        grid=(b,),
        in_specs=[pl.BlockSpec((1, k, hw), lambda i: (i, 0, 0)),
                  pl.BlockSpec((1, c, hw), lambda i: (i, 0, 0))],
        out_specs=pl.BlockSpec((1, k, c), lambda i: (i, 0, 0)),
        out_shape=jax.ShapeDtypeStruct((b, k, c), jnp.float32),
        compiler_params=pltpu.CompilerParams(dimension_semantics=("parallel",)),
    )
    return jax.jit(f)


def _corr_kernel(x_ref, p_ref, o_ref):
    x = x_ref[0].astype(jnp.float32)                       # (HW, C)
    p = p_ref[0].astype(jnp.float32)                       # (P, C)
    xn = x * jax.lax.rsqrt(jnp.sum(x * x, axis=1, keepdims=True) + _NORM_EPS)
    pn = p * jax.lax.rsqrt(jnp.sum(p * p, axis=1, keepdims=True) + _NORM_EPS)
    o_ref[0] = jax.lax.dot_general(
        xn.astype(jnp.bfloat16), pn.astype(jnp.bfloat16),
        (((1,), (1,)), ((), ())), preferred_element_type=jnp.float32)


@functools.lru_cache(maxsize=None)
def _build_corr(b, hw, c, p):
    f = pl.pallas_call(
        _corr_kernel,
        grid=(b,),
        in_specs=[pl.BlockSpec((1, hw, c), lambda i: (i, 0, 0)),
                  pl.BlockSpec((1, p, c), lambda i: (i, 0, 0))],
        out_specs=pl.BlockSpec((1, hw, p), lambda i: (i, 0, 0)),
        out_shape=jax.ShapeDtypeStruct((b, hw, p), jnp.float32),
        compiler_params=pltpu.CompilerParams(dimension_semantics=("parallel",)),
    )
    return jax.jit(f)


def get_correlation_map(x, protos):
    b, h, w, c = x.shape
    p = protos.shape[1]
    hw = h * w
    corr = _build_corr(b, hw, c, p)(x.reshape(b, hw, c), protos)
    return corr.reshape(b, h, w, p)


def _cos_kernel(t_ref, r_ref, o_ref):
    t = t_ref[0].astype(jnp.float32)
    r = r_ref[0].astype(jnp.float32)
    tn = t * jax.lax.rsqrt(jnp.sum(t * t, axis=1, keepdims=True) + _NORM_EPS)
    rn = r * jax.lax.rsqrt(jnp.sum(r * r, axis=1, keepdims=True) + _NORM_EPS)
    o_ref[0] = jax.lax.dot_general(
        tn.astype(jnp.bfloat16), rn.astype(jnp.bfloat16),
        (((1,), (1,)), ((), ())), preferred_element_type=jnp.float32)


@functools.lru_cache(maxsize=None)
def _build_cos(b, nt, nr, c):
    f = pl.pallas_call(
        _cos_kernel,
        grid=(b,),
        in_specs=[pl.BlockSpec((1, nt, c), lambda i: (i, 0, 0)),
                  pl.BlockSpec((1, nr, c), lambda i: (i, 0, 0))],
        out_specs=pl.BlockSpec((1, nt, nr), lambda i: (i, 0, 0)),
        out_shape=jax.ShapeDtypeStruct((b, nt, nr), jnp.float32),
        compiler_params=pltpu.CompilerParams(dimension_semantics=("parallel",)),
    )
    return jax.jit(f)


def knn(target, ref, k):
    b, nt, c = target.shape
    nr = ref.shape[1]
    corr = _build_cos(b, nt, nr, c)(target, ref)
    return jax.lax.top_k(corr, k)[1]          # top-k selection: plain JAX glue


def _fat_kernel(t_ref, r_ref, wq_ref, wkv_ref, wo_ref, o_ref):
    t = t_ref[0].astype(jnp.float32)                       # (N, C)
    c = t.shape[1]
    q = jnp.dot(t.astype(jnp.bfloat16), wq_ref[...],
                preferred_element_type=jnp.float32)
    kv = jnp.dot(r_ref[0].astype(jnp.bfloat16), wkv_ref[...],
                 preferred_element_type=jnp.float32)
    kk = kv[:, :c]
    v = kv[:, c:]
    logits = jax.lax.dot_general(
        q.astype(jnp.bfloat16), kk.astype(jnp.bfloat16),
        (((1,), (1,)), ((), ())),
        preferred_element_type=jnp.float32) * (1.0 / math.sqrt(float(c)))
    logits = logits - jnp.max(logits, axis=1, keepdims=True)
    e = jnp.exp(logits)
    attn = e * pl.reciprocal(jnp.sum(e, axis=1, keepdims=True), approx=True)
    agg = jnp.dot(attn.astype(jnp.bfloat16), v.astype(jnp.bfloat16),
                  preferred_element_type=jnp.float32)
    o_ref[0] = t + jnp.dot(agg.astype(jnp.bfloat16), wo_ref[...],
                           preferred_element_type=jnp.float32)


@functools.lru_cache(maxsize=None)
def _build_fat(b, n, m, c):
    f = pl.pallas_call(
        _fat_kernel,
        grid=(b,),
        in_specs=[pl.BlockSpec((1, n, c), lambda i: (i, 0, 0)),
                  pl.BlockSpec((1, m, c), lambda i: (i, 0, 0)),
                  pl.BlockSpec((c, c), lambda i: (0, 0)),
                  pl.BlockSpec((c, 2 * c), lambda i: (0, 0)),
                  pl.BlockSpec((c, c), lambda i: (0, 0))],
        out_specs=pl.BlockSpec((1, n, c), lambda i: (i, 0, 0)),
        out_shape=jax.ShapeDtypeStruct((b, n, c), jnp.float32),
        compiler_params=pltpu.CompilerParams(dimension_semantics=("parallel",)),
    )
    return jax.jit(f)


def fat_apply(fp, target, ref):
    """target (B,N,C), ref (B,M,C) -> (B,N,C). Residual cross-attention stub."""
    b, n, c = target.shape
    m = ref.shape[1]
    return _build_fat(b, n, m, c)(target, ref, fp['wq'], fp['wkv'], fp['wo'])


# ----------------------------------------------------------------------------
# Module forwards (NHWC, bf16 activations)
# ----------------------------------------------------------------------------

def basic_conv_raw(p, x, padding=0, dilation=1):
    """BasicConv2d (conv no-bias + BN): returns pre-BN output and BN scale/shift
    computed from fused batch statistics so callers can fuse the affine."""
    y, st = conv2d(x, p['w'], padding=padding, dilation=dilation)
    sc, sh = _bn_scale_shift(*st, p['g'], p['b'])
    return y, sc, sh


def basic_conv_bn(p, x, padding=0, dilation=1, relu=False):
    y, sc, sh = basic_conv_raw(p, x, padding=padding, dilation=dilation)
    return affine_terms([(y, sc, sh)], relu=relu)


def mffm(p, x):
    b, h, w, cin = x.shape
    cout = p['in_b'].shape[0]
    # branch0 (1x1 no-bias + BN) and in_conv (1x1 + bias) share x: co-tiled as
    # one N=2*cout matmul so x is read once and the 256-wide MXU is filled.
    shift = jnp.concatenate([jnp.zeros((cout,), jnp.float32),
                             p['in_b'].astype(jnp.float32)])
    y, (s1, s2, cnt) = mm_conv(x.reshape(-1, cin), p['w0in'], shift)
    x0_raw = y[:, :cout].reshape(b, h, w, cout)
    sq = y[:, cout:].reshape(b, h, w, cout)
    sc0, sh0 = _bn_scale_shift(s1[:cout], s2[:cout], cnt, p['bn0_g'], p['bn0_b'])

    x1_raw, sc1, sh1 = basic_conv_raw(p['branch1'], sq, padding=6, dilation=6)
    t = affine_terms([(x1_raw, sc1, sh1), (sq, None, None)])     # sq + BN(x1)
    x2_raw, sc2, sh2 = basic_conv_raw(p['branch2'], t, padding=12, dilation=12)
    t = affine_terms([(x2_raw, sc2, sh2), (sq, None, None)])     # sq + BN(x2)
    x3_raw, sc3, sh3 = basic_conv_raw(p['branch3'], t, padding=18, dilation=18)
    return affine_terms([(x0_raw, sc0, sh0), (x3_raw, sc3, sh3)], relu=True)


def res_block(p, x):
    h_raw, st1 = conv2d(x, p['c1a_w'], bias=p['c1a_b'], padding=1)
    sc, sh = _bn_scale_shift(*st1, p['bn1_g'], p['bn1_b'])
    h = affine_terms([(h_raw, sc, sh)], relu=True)
    h2, _ = conv2d(h, p['c1b_w'], bias=p['c1b_b'], padding=1)
    xr = affine_terms([(x, None, None), (h2, None, None)], relu=True)
    y_raw, st2 = conv2d(xr, p['c2_w'], bias=p['c2_b'], padding=1)
    sc2, sh2 = _bn_scale_shift(*st2, p['bn2_g'], p['bn2_b'])
    return affine_terms([(y_raw, sc2, sh2)], relu=True)


def fusion(p, x_low, x_high):
    x_mul = x_low * x_high
    x_cat = jnp.concatenate([x_low, x_mul], axis=-1)
    return basic_conv_bn(p['cat_conv'], x_cat, padding=1, relu=True)


def _kmeans_onehot(points, k, iters=10):
    # TODO(synk): original uses an external KMeans lib with random init.
    n = points.shape[0]
    cent0 = points[jnp.arange(k) % n]

    def assign(c):
        d = (jnp.sum(points * points, axis=1, keepdims=True)
             - 2.0 * points @ c.T + jnp.sum(c * c, axis=1)[None, :])
        return jnp.argmin(d, axis=1)

    def body(_, cent):
        labels = assign(cent)
        onehot = jax.nn.one_hot(labels, k, dtype=jnp.float32)
        counts = jnp.sum(onehot, axis=0)
        newc = (onehot.T @ points) / jnp.maximum(counts, 1.0)[:, None]
        return jnp.where(counts[:, None] > 0, newc, cent)

    cent = jax.lax.fori_loop(0, iters, body, cent0)
    labels = assign(cent)
    return jax.nn.one_hot(labels, k, dtype=jnp.float32).T      # (k, HW)


def get_kmeans_prototypes(x, k):
    b, h, w, c = x.shape
    hw = h * w
    pts = x.reshape(b, hw, c).astype(jnp.float32)
    masks = jax.vmap(lambda pp: _kmeans_onehot(pp, k))(pts)     # (B, k, HW)
    xcf = jnp.transpose(pts, (0, 2, 1))                         # (B, C, HW)
    return _build_mask_pool(b, k, c, hw)(masks, xcf)            # (B, k, C)


def slot_generator(p, target, ref_list):
    sqz_target, _ = conv2d(target, p['sqz_w'], bias=p['sqz_b'])
    slot_target, _ = conv2d(target, p['enc_w'], bias=p['enc_b'])
    target_pt = get_kmeans_prototypes(sqz_target, 64)
    slot_pt, slot_mask = get_global_prototypes(sqz_target, slot_target, dim=1)
    ref_pt_list = []
    for r in ref_list:
        sqz_ref, _ = conv2d(r, p['sqz_w'], bias=p['sqz_b'])
        ref_pt, _ = get_global_prototypes(sqz_ref, sqz_ref, dim=2)
        ref_pt_list.append(ref_pt)
    ref_block = jnp.concatenate(ref_pt_list, axis=1)
    agg_pt = fat_apply(p['fat'], target_pt, ref_block)          # (B, 64, C)
    ref_pt_list.append(agg_pt)
    return sqz_target, agg_pt, ref_pt_list, slot_pt, slot_mask


def prototype_filter(target, ref_list, k=16):
    # The torch loop overwrites new_ref_pt; only the last ref element matters.
    ref_last = ref_list[-1]
    topk = knn(target, ref_last, k)                             # (B, Nt, k)
    return jax.vmap(lambda r, t: r[t])(ref_last, topk)          # (B, Nt, k, C)


def slot_attention(p, ref_pt_list, slots, iters=3):
    for _ in range(iters):
        filt = prototype_filter(slots, ref_pt_list)
        b, nt, kk, c = filt.shape
        slots = fat_apply(p['fat'], slots, filt.reshape(b, nt * kk, c))
    return slots


def encoder_stub(p, img):
    # TODO(synk): pretrained SegFormer replaced by deterministic patch-embeds.
    feats = []
    x = img
    for w, patch in zip(p['ws'], p['patches']):
        x, _ = conv2d(x, w, stride=patch, relu=True)
        feats.append(x)
    return feats   # hidden_states[0..3]: channels 64/128/320/512


def bilinear_resize(img, oh, ow, align_corners=False):
    b, h, w, c = img.shape

    def coords(o, i):
        if align_corners:
            if o == 1:
                return jnp.zeros((o,), jnp.float32)
            return jnp.arange(o, dtype=jnp.float32) * (float(i - 1) / float(o - 1))
        cc = (jnp.arange(o, dtype=jnp.float32) + 0.5) * (float(i) / float(o)) - 0.5
        return jnp.clip(cc, 0.0, float(i - 1))

    ys, xs = coords(oh, h), coords(ow, w)
    y0 = jnp.clip(jnp.floor(ys).astype(jnp.int32), 0, h - 1)
    x0 = jnp.clip(jnp.floor(xs).astype(jnp.int32), 0, w - 1)
    y1 = jnp.minimum(y0 + 1, h - 1)
    x1 = jnp.minimum(x0 + 1, w - 1)
    wy = (ys - y0.astype(jnp.float32)).reshape(1, oh, 1, 1)
    wx = (xs - x0.astype(jnp.float32)).reshape(1, 1, ow, 1)
    rows = jnp.take(img, y0, axis=1) * (1.0 - wy) + jnp.take(img, y1, axis=1) * wy
    return (jnp.take(rows, x0, axis=2) * (1.0 - wx)
            + jnp.take(rows, x1, axis=2) * wx)


# ----------------------------------------------------------------------------
# Parameter construction (deterministic, kaiming fan_in/relu, weights in bf16)
# ----------------------------------------------------------------------------

class KeyGen:
    def __init__(self, seed=0):
        self._key = jax.random.PRNGKey(seed)

    def __call__(self):
        self._key, sub = jax.random.split(self._key)
        return sub


def _kaiming_hwio(key, kh, kw, cin, cout):
    std = math.sqrt(2.0 / (cin * kh * kw))
    w = jax.random.normal(key, (kh, kw, cin, cout), jnp.float32) * std
    return w.astype(jnp.bfloat16)


def make_conv(kg, cin, cout, k):
    return _kaiming_hwio(kg(), k, k, cin, cout), jnp.zeros((cout,), jnp.float32)


def make_basic_conv(kg, cin, cout, k):
    return {'w': _kaiming_hwio(kg(), k, k, cin, cout),
            'g': jnp.ones((cout,), jnp.float32),
            'b': jnp.zeros((cout,), jnp.float32)}


def make_mffm(kg, cin, cout):
    b0_w = _kaiming_hwio(kg(), 1, 1, cin, cout)
    in_w, in_b = make_conv(kg, cin, cout, 1)
    return {'w0in': jnp.concatenate([b0_w.reshape(cin, cout),
                                     in_w.reshape(cin, cout)], axis=1),
            'in_b': in_b,
            'bn0_g': jnp.ones((cout,), jnp.float32),
            'bn0_b': jnp.zeros((cout,), jnp.float32),
            'branch1': make_basic_conv(kg, cout, cout, 3),
            'branch2': make_basic_conv(kg, cout, cout, 3),
            'branch3': make_basic_conv(kg, cout, cout, 3)}


def make_res(kg, cin, cout):
    c1a_w, c1a_b = make_conv(kg, cin, cin, 3)
    c1b_w, c1b_b = make_conv(kg, cin, cin, 3)
    c2_w, c2_b = make_conv(kg, cin, cout, 3)
    return {'c1a_w': c1a_w, 'c1a_b': c1a_b,
            'bn1_g': jnp.ones((cin,), jnp.float32),
            'bn1_b': jnp.zeros((cin,), jnp.float32),
            'c1b_w': c1b_w, 'c1b_b': c1b_b,
            'c2_w': c2_w, 'c2_b': c2_b,
            'bn2_g': jnp.ones((cout,), jnp.float32),
            'bn2_b': jnp.zeros((cout,), jnp.float32)}


def make_fusion(kg, c):
    return {'cat_conv': make_basic_conv(kg, 2 * c, c, 3)}


def make_fat(kg, c):
    # TODO(synk): Feature_Aggregation_Transformer stub (single-head residual).
    def lin():
        w = jax.random.normal(kg(), (c, c), jnp.float32) * math.sqrt(2.0 / c)
        return w.astype(jnp.bfloat16)
    return {'wq': lin(),
            'wkv': jnp.concatenate([lin(), lin()], axis=1),
            'wo': lin()}


def make_slot_gen(kg, cin, cout, num_slots):
    sqz_w, sqz_b = make_conv(kg, cin, cout, 1)
    enc_w, enc_b = make_conv(kg, cin, num_slots, 1)
    return {'sqz_w': sqz_w, 'sqz_b': sqz_b,
            'enc_w': enc_w, 'enc_b': enc_b,
            'fat': make_fat(kg, cout)}


def make_encoder(kg):
    cfg = [(3, 64, 4), (64, 128, 2), (128, 320, 2), (320, 512, 2)]
    return {'ws': [_kaiming_hwio(kg(), k, k, ci, co) for ci, co, k in cfg],
            'patches': [k for _, _, k in cfg]}


def make_gsanet_params(seed=0, num_slots=2):
    kg = KeyGen(seed)
    p = {'rgb_encoder': make_encoder(kg), 'flow_encoder': make_encoder(kg)}
    for name, cin in [('MFFM1', 512), ('MFFM2', 320), ('MFFM3', 128), ('MFFM4', 64)]:
        p['rgb_' + name] = make_mffm(kg, cin, 128)
        p['flow_' + name] = make_mffm(kg, cin, 128)
    p['rgb_SG'] = make_slot_gen(kg, 128, 128, num_slots)
    p['flow_SG'] = make_slot_gen(kg, 128, 128, num_slots)
    p['rgb_SA'] = {'fat': make_fat(kg, 128)}
    p['flow_SA'] = {'fat': make_fat(kg, 128)}
    p['fusion1'] = make_fusion(kg, 128)
    p['fusion2'] = make_fusion(kg, 128)
    p['fusion3'] = make_fusion(kg, 128)
    p['rgb_fusion'] = make_conv(kg, 128 + 64 + num_slots, 128, 1)
    p['flow_fusion'] = make_conv(kg, 128 + 64 + num_slots, 128, 1)
    p['total_fuse1'] = make_res(kg, 256, 128)
    p['total_fuse2'] = make_res(kg, 256, 128)
    p['total_fuse3'] = make_res(kg, 256, 128)
    p['total_fuse4'] = make_res(kg, 256, 128)
    p['linearr5'] = make_conv(kg, 128, 1, 3)
    p['linearr6'] = make_conv(kg, 128, 1, 3)
    p['linearr7'] = make_conv(kg, 128, 1, 3)
    p['linearr8'] = make_conv(kg, 128, 1, 3)
    return p


# ----------------------------------------------------------------------------
# GSANet forward
# ----------------------------------------------------------------------------

def _encode_refs(p_enc, p_mffm, ref_nchw):
    # fold the N reference frames into the batch dim: one encoder/MFFM chain.
    b, c3, h, w = ref_nchw.shape
    n = c3 // 3
    r = ref_nchw.reshape(b, n, 3, h, w)
    r = jnp.transpose(r, (0, 1, 3, 4, 2)).reshape(b * n, h, w, 3)
    f4 = mffm(p_mffm, encoder_stub(p_enc, r)[3])
    _, h4, w4, c4 = f4.shape
    f4 = f4.reshape(b, n, h4, w4, c4)
    return [f4[:, i] for i in range(n)]


def gsanet_forward(p, rgb, flow, rgb_ref, flow_ref):
    shape = rgb.shape[2:]
    rgb_nhwc = jnp.transpose(rgb, (0, 2, 3, 1))
    flow_nhwc = jnp.transpose(flow, (0, 2, 3, 1))

    rgb_ref4 = _encode_refs(p['rgb_encoder'], p['rgb_MFFM1'], rgb_ref)
    flow_ref4 = _encode_refs(p['flow_encoder'], p['flow_MFFM1'], flow_ref)

    x1_r, x2_r, x3_r, x4_r = encoder_stub(p['rgb_encoder'], rgb_nhwc)
    x1_f, x2_f, x3_f, x4_f = encoder_stub(p['flow_encoder'], flow_nhwc)

    x1_r, x2_r = mffm(p['rgb_MFFM4'], x1_r), mffm(p['rgb_MFFM3'], x2_r)
    x3_r, x4_r = mffm(p['rgb_MFFM2'], x3_r), mffm(p['rgb_MFFM1'], x4_r)
    x1_f, x2_f = mffm(p['flow_MFFM4'], x1_f), mffm(p['flow_MFFM3'], x2_f)
    x3_f, x4_f = mffm(p['flow_MFFM2'], x3_f), mffm(p['flow_MFFM1'], x4_f)

    (sqz_x3_r, rgb_agg_pt, rgb_ref_pt_list,
     rgb_slots, rgb_slot_mask) = slot_generator(p['rgb_SG'], x3_r, rgb_ref4)
    (sqz_x3_f, flow_agg_pt, flow_ref_pt_list,
     flow_slots, flow_slot_mask) = slot_generator(p['flow_SG'], x3_f, flow_ref4)

    rgb_refine_slots = slot_attention(p['rgb_SA'], rgb_ref_pt_list, rgb_slots)
    flow_refine_slots = slot_attention(p['flow_SA'], flow_ref_pt_list, flow_slots)

    new_x3_r = get_correlation_map(sqz_x3_r, rgb_agg_pt)
    new_x3_f = get_correlation_map(sqz_x3_f, flow_agg_pt)
    slot_x3_r = get_correlation_map(sqz_x3_r, rgb_refine_slots)
    slot_x3_f = get_correlation_map(sqz_x3_f, flow_refine_slots)

    rw, rb = p['rgb_fusion']
    fw, fb = p['flow_fusion']
    cat_r = jnp.concatenate(
        [x3_r, new_x3_r.astype(_ACT_DT), slot_x3_r.astype(_ACT_DT)], axis=-1)
    cat_f = jnp.concatenate(
        [x3_f, new_x3_f.astype(_ACT_DT), slot_x3_f.astype(_ACT_DT)], axis=-1)
    x3_r, _ = conv2d(cat_r, rw, bias=rb)
    x3_f, _ = conv2d(cat_f, fw, bias=fb)

    x1 = res_block(p['total_fuse1'], jnp.concatenate([x1_r, x1_f], axis=-1))
    x2 = res_block(p['total_fuse2'], jnp.concatenate([x2_r, x2_f], axis=-1))
    x3 = res_block(p['total_fuse3'], jnp.concatenate([x3_r, x3_f], axis=-1))
    x4 = res_block(p['total_fuse4'], jnp.concatenate([x4_r, x4_f], axis=-1))

    x2 = bilinear_resize(x2, x2.shape[1] * 2, x2.shape[2] * 2).astype(_ACT_DT)
    x3 = bilinear_resize(x3, x3.shape[1] * 4, x3.shape[2] * 4).astype(_ACT_DT)
    x4 = bilinear_resize(x4, x4.shape[1] * 8, x4.shape[2] * 8).astype(_ACT_DT)

    SA_4 = x4
    SA_3 = fusion(p['fusion3'], x3, SA_4)
    SA_2 = fusion(p['fusion2'], x2, SA_3)
    SA_1 = fusion(p['fusion1'], x1, SA_2)

    map_24, _ = conv2d(SA_4, p['linearr8'][0], bias=p['linearr8'][1],
                       padding=1, out_dtype=jnp.float32)
    m23, _ = conv2d(SA_3, p['linearr7'][0], bias=p['linearr7'][1],
                    padding=1, out_dtype=jnp.float32)
    m22, _ = conv2d(SA_2, p['linearr6'][0], bias=p['linearr6'][1],
                    padding=1, out_dtype=jnp.float32)
    m21, _ = conv2d(SA_1, p['linearr5'][0], bias=p['linearr5'][1],
                    padding=1, out_dtype=jnp.float32)
    map_23 = m23 + map_24
    map_22 = m22 + map_23
    map_21 = m21 + map_22

    def rs(m):
        return bilinear_resize(m, shape[0], shape[1], align_corners=True)

    def to_nchw(m):
        return jnp.transpose(m, (0, 3, 1, 2))

    out_1 = to_nchw(jax.nn.sigmoid(rs(map_21)))
    out_2 = to_nchw(jax.nn.sigmoid(rs(map_22)))
    out_3 = to_nchw(jax.nn.sigmoid(rs(map_23)))
    out_4 = to_nchw(jax.nn.sigmoid(rs(map_24)))

    slot_x3_r = (slot_x3_r + 1.0) / 2.0
    slot_x3_f = (slot_x3_f + 1.0) / 2.0
    fg_rgb_rm, bg_rgb_rm = slot_x3_r[..., 0:1], slot_x3_r[..., 1:2]
    fg_flow_rm, bg_flow_rm = slot_x3_f[..., 0:1], slot_x3_f[..., 1:2]

    preds_list = [out_1, out_2, out_3, out_4]
    coarse_slot_list = [to_nchw(rs(rgb_slot_mask[..., 0:1])),
                        to_nchw(rs(flow_slot_mask[..., 0:1]))]
    fine_slot_list = [to_nchw(rs(fg_rgb_rm)), to_nchw(rs(1.0 - bg_rgb_rm)),
                      to_nchw(rs(fg_flow_rm)), to_nchw(rs(1.0 - bg_flow_rm))]
    total_list = preds_list + coarse_slot_list + fine_slot_list
    return total_list, fine_slot_list


# ----------------------------------------------------------------------------
# Main
# ----------------------------------------------------------------------------

if __name__ == "__main__":
    B, H, W = 2, 64, 64
    key = jax.random.PRNGKey(0)
    k1, k2, k3, k4 = jax.random.split(key, 4)
    rgb = jax.random.normal(k1, (B, 3, H, W), jnp.float32)
    flow = jax.random.normal(k2, (B, 3, H, W), jnp.float32)
    rgb_ref = jax.random.normal(k3, (B, 3, H, W), jnp.float32)    # 1 ref frame
    flow_ref = jax.random.normal(k4, (B, 3, H, W), jnp.float32)   # 1 ref frame

    params = make_gsanet_params(seed=0, num_slots=2)
    total_list, fine_slot_list = gsanet_forward(params, rgb, flow, rgb_ref, flow_ref)
    jax.block_until_ready(total_list)
    jax.block_until_ready(fine_slot_list)
    print("KERNEL_OK")
</pallas_src>

<mosaic_0001>
module attributes {stable_mosaic.version = 11 : i64} {
  func.func @kernel(%arg0: i32, %arg1: memref<512x48xbf16, #tpu.memory_space<vmem>>, %arg2: memref<48x64xbf16, #tpu.memory_space<vmem>>, %arg3: memref<1x64xf32, #tpu.memory_space<vmem>>, %arg4: memref<512x64xbf16, #tpu.memory_space<vmem>>, %arg5: memref<1x2x64xf32, #tpu.memory_space<vmem>>) attributes {dimension_semantics = [#tpu.dimension_semantics<parallel>], iteration_bounds = array<i64: 1>, scalar_prefetch = 0 : i64, scratch_operands = 0 : i64, tpu.core_type = #tpu.core_type<tc>, window_params = [{transform_indices = @transform_0, window_bounds = array<i64: 512, 48>}, {pipeline_mode = #tpu.pipeline_mode<synchronous>, transform_indices = @transform_1, window_bounds = array<i64: 48, 64>}, {pipeline_mode = #tpu.pipeline_mode<synchronous>, transform_indices = @transform_2, window_bounds = array<i64: 1, 64>}, {transform_indices = @transform_3, window_bounds = array<i64: 512, 64>}, {transform_indices = @transform_4, window_bounds = array<i64: 1, 2, 64>}]} {
    %c0 = arith.constant 0 : index
    %c0_0 = arith.constant 0 : index
    %0 = vector.load %arg1[%c0, %c0_0] : memref<512x48xbf16, #tpu.memory_space<vmem>>, vector<512x48xbf16>
    %c0_1 = arith.constant 0 : index
    %c0_2 = arith.constant 0 : index
    %1 = vector.load %arg2[%c0_1, %c0_2] : memref<48x64xbf16, #tpu.memory_space<vmem>>, vector<48x64xbf16>
    %cst = arith.constant dense<0.000000e+00> : vector<512x64xf32>
    %2 = tpu.matmul %0, %1, %cst {dimension_numbers = #tpu.dot_dimension_numbers<[1], [0], [0], [1], [0, 0, 1, 1], [], []>} : vector<512x48xbf16>, vector<48x64xbf16>, vector<512x64xf32> -> vector<512x64xf32>
    %c0_3 = arith.constant 0 : index
    %c0_4 = arith.constant 0 : index
    %3 = vector.load %arg3[%c0_3, %c0_4] : memref<1x64xf32, #tpu.memory_space<vmem>>, vector<1x64xf32>
    %4 = vector.broadcast %3 : vector<1x64xf32> to vector<512x64xf32>
    %5 = arith.addf %2, %4 : vector<512x64xf32>
    %cst_5 = arith.constant dense<0.000000e+00> : vector<64xf32>
    %6 = vector.multi_reduction <add>, %5, %cst_5 [0] : vector<512x64xf32> to vector<64xf32>
    %7 = vector.shape_cast %6 : vector<64xf32> to vector<1x64xf32>
    %c0_6 = arith.constant 0 : index
    %c0_7 = arith.constant 0 : index
    %c0_8 = arith.constant 0 : index
    %8 = vector.load %arg5[%c0_6, %c0_7, %c0_8] : memref<1x2x64xf32, #tpu.memory_space<vmem>>, vector<1x1x64xf32>
    %9 = vector.shape_cast %8 : vector<1x1x64xf32> to vector<1x64xf32>
    %10 = vector.shape_cast %7 : vector<1x64xf32> to vector<1x1x64xf32>
    tpu.vector_store %arg5[%c0_6, %c0_7, %c0_8], %10 {strides = array<i32>} : memref<1x2x64xf32, #tpu.memory_space<vmem>>, vector<1x1x64xf32>,
    %11 = arith.mulf %5, %5 : vector<512x64xf32>
    %cst_9 = arith.constant dense<0.000000e+00> : vector<64xf32>
    %12 = vector.multi_reduction <add>, %11, %cst_9 [0] : vector<512x64xf32> to vector<64xf32>
    %13 = vector.shape_cast %12 : vector<64xf32> to vector<1x64xf32>
    %c0_10 = arith.constant 0 : index
    %c1 = arith.constant 1 : index
    %c0_11 = arith.constant 0 : index
    %14 = vector.load %arg5[%c0_10, %c1, %c0_11] : memref<1x2x64xf32, #tpu.memory_space<vmem>>, vector<1x1x64xf32>
    %15 = vector.shape_cast %14 : vector<1x1x64xf32> to vector<1x64xf32>
    %16 = vector.shape_cast %13 : vector<1x64xf32> to vector<1x1x64xf32>
    tpu.vector_store %arg5[%c0_10, %c1, %c0_11], %16 {strides = array<i32>} : memref<1x2x64xf32, #tpu.memory_space<vmem>>, vector<1x1x64xf32>,
    %cst_12 = arith.constant 0.000000e+00 : f32
    %17 = vector.broadcast %cst_12 : f32 to vector<512x64xf32>
    %18 = arith.maximumf %5, %17 : vector<512x64xf32>
    %19 = arith.truncf %18 : vector<512x64xf32> to vector<512x64xbf16>
    %c0_13 = arith.constant 0 : index
    %c0_14 = arith.constant 0 : index
    %20 = vector.load %arg4[%c0_13, %c0_14] : memref<512x64xbf16, #tpu.memory_space<vmem>>, vector<512x64xbf16>
    tpu.vector_store %arg4[%c0_13, %c0_14], %19 {strides = array<i32>} : memref<512x64xbf16, #tpu.memory_space<vmem>>, vector<512x64xbf16>,
    return
  }
  func.func @transform_0(%arg0: i32) -> (i32, i32) {
    %c0_i32 = arith.constant 0 : i32
    %c0_i32_0 = arith.constant 0 : i32
    return %arg0, %c0_i32 : i32, i32
  }
  func.func @transform_1(%arg0: i32) -> (i32, i32) {
    %c0_i32 = arith.constant 0 : i32
    %c0_i32_0 = arith.constant 0 : i32
    %c0_i32_1 = arith.constant 0 : i32
    return %c0_i32, %c0_i32_0 : i32, i32
  }
  func.func @transform_2(%arg0: i32) -> (i32, i32) {
    %c0_i32 = arith.constant 0 : i32
    %c0_i32_0 = arith.constant 0 : i32
    %c0_i32_1 = arith.constant 0 : i32
    return %c0_i32, %c0_i32_0 : i32, i32
  }
  func.func @transform_3(%arg0: i32) -> (i32, i32) {
    %c0_i32 = arith.constant 0 : i32
    %c0_i32_0 = arith.constant 0 : i32
    return %arg0, %c0_i32 : i32, i32
  }
  func.func @transform_4(%arg0: i32) -> (i32, i32, i32) {
    %c0_i32 = arith.constant 0 : i32
    %c0_i32_0 = arith.constant 0 : i32
    %c0_i32_1 = arith.constant 0 : i32
    return %arg0, %c0_i32, %c0_i32_0 : i32, i32, i32
  }
}

</mosaic_0001>

<bundles_post_ra>
// kernel: tpu_custom_call.1
= control target key start
LH: loop header
LB: loop body
LE: loop exit
PB: predicated region body
PF: predicated region fallthrough
CT: control target
= control target key end

     0   :  { %vm273_vm0 = vcmask 392192   ;;  %s2515_s0 = inlined_call_operand.vmem [shape: bf16[512,48], index: 0, kind: input, shape index: {}]   ;;  %s2516_s1 = inlined_call_operand.vmem [shape: bf16[48,64], index: 1, kind: input, shape index: {}]   ;;  %s2517_s2 = inlined_call_operand.vmem [shape: f32[1,64], index: 2, kind: input, shape index: {}]   ;;  %s2518_s3 = inlined_call_operand.vmem [shape: bf16[512,64], index: 3, kind: output, shape index: {0}]   ;;  %s2519_s4 = inlined_call_operand.hbm [shape: f32[1,2,64], index: 4, kind: output, shape index: {1}]  }
   0x1   :  { %v1704_v0 = vld [vmem:[%s2516_s1 + $0x10] sm:$0xff]   ;;  %v1705_v1 = vld [vmem:[%s2516_s1 + $0x8] sm:$0xff]   ;;  %v1707_v2 = vld [vmem:[%s2515_s0] sm:$0xff]  }
   0x2   :  { %1627 = vmatprep.subr.bf16.mxu0 %v1704_v0  ;;  %1697 = vmatprep.subr.bf16.mxu1 %v1704_v0  ;;  %v1706_v3 = vld [vmem:[%s2516_s1] sm:$0xff]   ;;  %v1708_v4 = vld [vmem:[%s2515_s0 + $0x8] sm:$0xff]   ;;  %v1709_v5 = vld [vmem:[%s2515_s0 + $0x10] sm:$0xff]  }
   0x3   :  { %1628 = vmatpush3.bf16.msra.mxu0 %v1704_v0  ;;  %1700 = vmatpush3.bf16.msra.mxu1 %v1704_v0  ;;  %v1710_v6 = vld [vmem:[%s2515_s0 + $0x18] sm:$0xff]   ;;  %v1711_v7 = vld [vmem:[%s2515_s0 + $0x20] sm:$0xff]   ;;  %v1724_v9 = vld [vmem:[%s2515_s0 + $0x88] sm:$0xff]  }
   0x4   :  { %1629 = vmatprep.subr.bf16.mxu0 %v1705_v1  ;;  %1698 = vmatprep.subr.bf16.mxu1 %v1705_v1  ;;  %v1723_v8 = vld [vmem:[%s2515_s0 + $0x80] sm:$0xff]   ;;  %v1725_v10 = vld [vmem:[%s2515_s0 + $0x90] sm:$0xff]   ;;  %v1712_v11 = vld [vmem:[%s2515_s0 + $0x28] sm:$0xff]  }
   0x5   :  { %1633 = vmatprep.mubr.msk.bf16.mxu0 %vm273_vm0, %v1707_v2  ;;  %1665 = vmatprep.mubr.msk.bf16.mxu1 %vm273_vm0, %v1723_v8  ;;  %v1713_v12 = vld [vmem:[%s2515_s0 + $0x30] sm:$0xff]   ;;  %v1726_v13 = vld [vmem:[%s2515_s0 + $0x98] sm:$0xff]   ;;  %v1727_v14 = vld [vmem:[%s2515_s0 + $0xa0] sm:$0xff]  }
   0x6   :  { %v1714_v15 = vld [vmem:[%s2515_s0 + $0x38] sm:$0xff]   ;;  %v1728_v16 = vld [vmem:[%s2515_s0 + $0xa8] sm:$0xff]   ;;  %v1715_v17 = vld [vmem:[%s2515_s0 + $0x40] sm:$0xff]  }
   0x7   :  { %1630 = vmatpush3.bf16.msra.mxu0 %v1705_v1  ;;  %1701 = vmatpush3.bf16.msra.mxu1 %v1705_v1  ;;  %v1729_v18 = vld [vmem:[%s2515_s0 + $0xb0] sm:$0xff]  }
   0x8   :  { %1631 = vmatprep.subr.bf16.mxu0 %v1706_v3  ;;  %1699 = vmatprep.subr.bf16.mxu1 %v1706_v3 }
   0xb   :  { %1632 = vmatpush3.bf16.msra.mxu0 %v1706_v3  ;;  %1702 = vmatpush3.bf16.msra.mxu1 %v1706_v3 }
   0xe   :  { %1634 = vmatmul.mubr.msk.bf16.vlgmr.msra.gmra.mxu0 %vm273_vm0, %v1708_v4  ;;  %1666 = vmatmul.mubr.msk.bf16.vlgmr.msra.gmra.mxu1 %vm273_vm0, %v1724_v9 }
   0xf   :  { %1637 = vmatprep.mubr.msk.bf16.mxu0 %vm273_vm0, %v1709_v5  ;;  %1669 = vmatprep.mubr.msk.bf16.mxu1 %vm273_vm0, %v1725_v10 }
  0x16   :  { %1638 = vmatmul.mubr.msk.bf16.gmra.mxu0 %vm273_vm0, %v1710_v6  ;;  %1670 = vmatmul.mubr.msk.bf16.gmra.mxu1 %vm273_vm0, %v1726_v13 }
  0x17   :  { %1641 = vmatprep.mubr.msk.bf16.mxu0 %vm273_vm0, %v1711_v7  ;;  %1673 = vmatprep.mubr.msk.bf16.mxu1 %vm273_vm0, %v1727_v14 }
  0x1e   :  { %1642 = vmatmul.mubr.msk.bf16.gmra.mxu0 %vm273_vm0, %v1712_v11 }
  0x1f   :  { %1645 = vmatprep.mubr.msk.bf16.mxu0 %vm273_vm0, %v1713_v12 }
  0x20   :  { %10 = vsyncpa [#allocation3], 0  ;;  %1674 = vmatmul.mubr.msk.bf16.gmra.mxu1 %vm273_vm0, %v1728_v16  ;;  %v1716_v19 = vld [vmem:[%s2515_s0 + $0x48] sm:$0xff]   ;;  %v1730_v20 = vld [vmem:[%s2515_s0 + $0xb8] sm:$0xff]   ;;  %vm1313_vm1 = vcmask 519168   ;;  %vm659_vm2 = vcmask 523264  }
  0x21   :  { %1677 = vmatprep.mubr.msk.bf16.mxu1 %vm273_vm0, %v1729_v18  ;;  %v1717_v21 = vld [vmem:[%s2515_s0 + $0x50] sm:$0xff]   ;;  %v1731_v22 = vld [vmem:[%s2515_s0 + $0xc0] sm:$0xff]   ;;  %v1718_v23 = vld [vmem:[%s2515_s0 + $0x58] sm:$0xff]   ;;  %vm793_vm3 = vcmask 516096  }
  0x22   :  { %v1732_v24 = vld [vmem:[%s2515_s0 + $0xc8] sm:$0xff]   ;;  %v1719_v25 = vld [vmem:[%s2515_s0 + $0x60] sm:$0xff]   ;;  %v1733_v26 = vld [vmem:[%s2515_s0 + $0xd0] sm:$0xff]  }
  0x23   :  { %v1720_v27 = vld [vmem:[%s2515_s0 + $0x68] sm:$0xff]   ;;  %v1734_v28 = vld [vmem:[%s2515_s0 + $0xd8] sm:$0xff]   ;;  %v1721_v29 = vld [vmem:[%s2515_s0 + $0x70] sm:$0xff]  }
  0x24   :  { %v1735_v30 = vld [vmem:[%s2515_s0 + $0xe0] sm:$0xff]   ;;  %v1722_v31 = vld [vmem:[%s2515_s0 + $0x78] sm:$0xff]   ;;  %v1736_v32 = vld [vmem:[%s2515_s0 + $0xe8] sm:$0xff]  }
  0x25   :  { %v1737_v33 = vld [vmem:[%s2515_s0 + $0xf0] sm:$0xff]   ;;  %v1738_v34 = vld [vmem:[%s2515_s0 + $0xf8] sm:$0xff]   ;;  %v1928_v35 = vld [vmem:[%s2517_s2] ss:$0 sm:$0xff] }
  0x26   :  { %1646 = vmatmul.mubr.msk.bf16.gmra.mxu0 %vm273_vm0, %v1714_v15 }
  0x27   :  { %1649 = vmatprep.mubr.msk.bf16.mxu0 %vm273_vm0, %v1715_v17 }
  0x28   :  { %1678 = vmatmul.mubr.msk.bf16.gmra.mxu1 %vm273_vm0, %v1730_v20 }
  0x29   :  { %1681 = vmatprep.mubr.msk.bf16.mxu1 %vm273_vm0, %v1731_v22 }
  0x2e   :  { %1650 = vmatmul.mubr.msk.bf16.gmra.mxu0 %vm273_vm0, %v1716_v19 }
  0x2f   :  { %1653 = vmatprep.mubr.msk.bf16.mxu0 %vm273_vm0, %v1717_v21 }
  0x30   :  { %1682 = vmatmul.mubr.msk.bf16.gmra.mxu1 %vm273_vm0, %v1732_v24 }
  0x31   :  { %1685 = vmatprep.mubr.msk.bf16.mxu1 %vm273_vm0, %v1733_v26 }
  0x36   :  { %1654 = vmatmul.mubr.msk.bf16.gmra.mxu0 %vm273_vm0, %v1718_v23 }
  0x37   :  { %1657 = vmatprep.mubr.msk.bf16.mxu0 %vm273_vm0, %v1719_v25 }
  0x38   :  { %1686 = vmatmul.mubr.msk.bf16.gmra.mxu1 %vm273_vm0, %v1734_v28 }
  0x39   :  { %1689 = vmatprep.mubr.msk.bf16.mxu1 %vm273_vm0, %v1735_v30 }
  0x3e   :  { %1658 = vmatmul.mubr.msk.bf16.gmra.mxu0 %vm273_vm0, %v1720_v27 }
  0x3f   :  { %1661 = vmatprep.mubr.msk.bf16.mxu0 %vm273_vm0, %v1721_v29 }
  0x40   :  { %1690 = vmatmul.mubr.msk.bf16.gmra.mxu1 %vm273_vm0, %v1736_v32 }
  0x41   :  { %1693 = vmatprep.mubr.msk.bf16.mxu1 %vm273_vm0, %v1737_v33 }
  0x46   :  { %1662 = vmatmul.mubr.msk.bf16.gmra.mxu0 %vm273_vm0, %v1722_v31 }
  0x48   :  { %1694 = vmatmul.mubr.msk.bf16.gmra.mxu1 %vm273_vm0, %v1738_v34 }
  0xce   :  { %v1635_v36 = vpop.f32.mrf.mxu0  ;;  %v1667_v53 = vpop.f32.mrf.mxu1 }
  0xcf   :  { %v413_v37 = vadd.f32 %v1635_v36, %v1928_v35  ;;  %v1978_v31 = vadd.f32 %v1667_v53, %v1928_v35 }
  0xd0   :  { %v404_v38 = vpop.f32.mrf.mxu0  ;;  %v1945_v62 = vpop.f32.mrf.mxu1 }
  0xd1   :  { %v995_v39 = vmax.f32 %v413_v37, 0.0  ;;  %v405_v40 = vadd.f32 %v1928_v35, %v404_v38  ;;  %v797_v48 = vmul.f32 %v413_v37, %v413_v37  ;;  %v663_v63 = vsel %vm659_vm2, %v413_v37, 0.0 }
  0xd2   :  { %v1636_v41 = vpop.f32.mrf.mxu0  ;;  %v1955_v8 = vpop.f32.mrf.mxu1 }
  0xd3   :  { %v1530_v42 = vpack.c.bf16 %v995_v39, %v995_v39  ;;  %v993_v43 = vmax.f32 %v405_v40, 0.0  ;;  %v416_v44 = vadd.f32 %v1636_v41, %v1928_v35  ;;  %v795_v46 = vmul.f32 %v405_v40, %v405_v40 }
  0xd4   :  { %v407_v45 = vpop.f32.mrf.mxu0  ;;  %v660_v49 = vsel %vm659_vm2, %v405_v40, 0.0  ;;  %v862_v9 = vsel %vm659_vm2, %v797_v48, 0.0  ;;  %v1965_v17 = vpop.f32.mrf.mxu1 }
  0xd5   :  { %1316 = vst.msk [vmem:[%s2518_s3 + $0x8] sm:$0xf] %vm1313_vm1, %v1530_v42  ;;  %v408_v47 = vadd.f32 %v1928_v35, %v407_v45  ;;  %v1528_v50 = vpack.c.bf16 %v993_v43, %v993_v43  ;;  %v996_v51 = vmax.f32 %v416_v44, 0.0  ;;  %v798_v58 = vmul.f32 %v416_v44, %v416_v44 }
  0xd6   :  { %v1639_v52 = vpop.f32.mrf.mxu0  ;;  %v859_v0 = vsel %vm659_vm2, %v795_v46, 0.0  ;;  %v665_v10 = vsel %vm659_vm2, %v416_v44, 0.0  ;;  %v1973_v27 = vpop.f32.mrf.mxu1 }
  0xd7   :  { %v661_v54 = vsel %vm659_vm2, %v408_v47, 0.0  ;;  %v796_v55 = vmul.f32 %v408_v47, %v408_v47  ;;  %v994_v56 = vmax.f32 %v408_v47, 0.0  ;;  %v429_v57 = vadd.f32 %v1639_v52, %v1928_v35  ;;  %1314 = vst.msk [vmem:[%s2518_s3] sm:$0xf] %vm1313_vm1, %v1528_v50 }
  0xd8   :  { %v1531_v59 = vpack.c.bf16 %v996_v51, %v996_v51  ;;  %v662_v60 = vadd.f32 %v661_v54, %v660_v49  ;;  %v420_v61 = vpop.f32.mrf.mxu0  ;;  %v864_v12 = vsel %vm659_vm2, %v798_v58, 0.0  ;;  %v1981_v38 = vpop.f32.mrf.mxu1 }
  0xd9   :  { %v860_v1 = vsel %vm659_vm2, %v796_v55, 0.0  ;;  %v1529_v2 = vpack.c.bf16 %v994_v56, %v994_v56  ;;  %v999_v5 = vmax.f32 %v429_v57, 0.0  ;;  %v421_v6 = vadd.f32 %v1928_v35, %v420_v61 }
  0xda   :  { %1317 = vst.msk [vmem:[%s2518_s3 + $0xc] sm:$0xf] %vm1313_vm1, %v1531_v59  ;;  %v664_v3 = vadd.f32 %v663_v63, %v662_v60  ;;  %v861_v4 = vadd.f32 %v860_v1, %v859_v0  ;;  %v1640_v7 = vpop.f32.mrf.mxu0  ;;  %v801_v18 = vmul.f32 %v429_v57, %v429_v57  ;;  %v671_v39 = vsel %vm659_vm2, %v429_v57, 0.0  ;;  %v1996_v52 = vpop.f32.mrf.mxu1 }
  0xdb   :  { %1315 = vst.msk [vmem:[%s2518_s3 + $0x4] sm:$0xf] %vm1313_vm1, %v1529_v2  ;;  %v432_v11 = vadd.f32 %v1640_v7, %v1928_v35  ;;  %v1534_v14 = vpack.c.bf16 %v999_v5, %v999_v5  ;;  %v667_v19 = vsel %vm659_vm2, %v421_v6, 0.0  ;;  %v799_v20 = vmul.f32 %v421_v6, %v421_v6 }
  0xdc   :  { %v863_v13 = vadd.f32 %v862_v9, %v861_v4  ;;  %v666_v15 = vadd.f32 %v665_v10, %v664_v3  ;;  %v423_v16 = vpop.f32.mrf.mxu0  ;;  %v997_v21 = vmax.f32 %v421_v6, 0.0  ;;  %v870_v40 = vsel %vm659_vm2, %v801_v18, 0.0  ;;  %v2012_v9 = vpop.f32.mrf.mxu1 }
  0xdd   :  { %1320 = vst.msk [vmem:[%s2518_s3 + $0x18] sm:$0xf] %vm1313_vm1, %v1534_v14  ;;  %v1000_v24 = vmax.f32 %v432_v11, 0.0  ;;  %v424_v25 = vadd.f32 %v1928_v35, %v423_v16  ;;  %v866_v28 = vsel %vm659_vm2, %v799_v20, 0.0  ;;  %v802_v43 = vmul.f32 %v432_v11, %v432_v11 }
  0xde   :  { %v668_v22 = vadd.f32 %v667_v19, %v666_v15  ;;  %v865_v23 = vadd.f32 %v864_v12, %v863_v13  ;;  %v1643_v26 = vpop.f32.mrf.mxu0  ;;  %v1532_v29 = vpack.c.bf16 %v997_v21, %v997_v21  ;;  %v673_v48 = vsel %vm659_vm2, %v432_v11, 0.0 }
  0xdf   :  { %v445_v30 = vadd.f32 %v1643_v26, %v1928_v35  ;;  %v1535_v33 = vpack.c.bf16 %v1000_v24, %v1000_v24  ;;  %v669_v34 = vsel %vm659_vm2, %v424_v25, 0.0  ;;  %v800_v36 = vmul.f32 %v424_v25, %v424_v25 }
  0xe0   :  { %v867_v32 = vadd.f32 %v866_v28, %v865_v23  ;;  %v436_v37 = vpop.f32.mrf.mxu0  ;;  %1318 = vst.msk [vmem:[%s2518_s3 + $0x10] sm:$0xf] %vm1313_vm1, %v1532_v29  ;;  %v670_v41 = vadd.f32 %v669_v34, %v668_v22  ;;  %v998_v42 = vmax.f32 %v424_v25, 0.0  ;;  %v872_v63 = vsel %vm659_vm2, %v802_v43, 0.0 }
  0xe1   :  { %1321 = vst.msk [vmem:[%s2518_s3 + $0x1c] sm:$0xf] %vm1313_vm1, %v1535_v33  ;;  %v868_v44 = vsel %vm659_vm2, %v800_v36, 0.0  ;;  %v1003_v45 = vmax.f32 %v445_v30, 0.0  ;;  %v437_v46 = vadd.f32 %v1928_v35, %v436_v37  ;;  %v805_v53 = vmul.f32 %v445_v30, %v445_v30 }
  0xe2   :  { %v1644_v47 = vpop.f32.mrf.mxu0  ;;  %v672_v49 = vadd.f32 %v671_v39, %v670_v41  ;;  %v869_v50 = vadd.f32 %v868_v44, %v867_v32  ;;  %v1533_v51 = vpack.c.bf16 %v998_v42, %v998_v42  ;;  %v679_v0 = vsel %vm659_vm2, %v445_v30, 0.0  ;;  %v2025_v30 = vpop.f32.mrf.mxu1 }
  0xe3   :  { %v1538_v54 = vpack.c.bf16 %v1003_v45, %v1003_v45  ;;  %v803_v55 = vmul.f32 %v437_v46, %v437_v46  ;;  %v1001_v56 = vmax.f32 %v437_v46, 0.0  ;;  %v448_v60 = vadd.f32 %v1644_v47, %v1928_v35 }
  0xe4   :  { %v439_v57 = vpop.f32.mrf.mxu0  ;;  %v871_v58 = vadd.f32 %v870_v40, %v869_v50  ;;  %1319 = vst.msk [vmem:[%s2518_s3 + $0x14] sm:$0xf] %vm1313_vm1, %v1533_v51  ;;  %v674_v59 = vadd.f32 %v673_v48, %v672_v49  ;;  %v675_v1 = vsel %vm659_vm2, %v437_v46, 0.0  ;;  %v878_v15 = vsel %vm659_vm2, %v805_v53, 0.0  ;;  %v2040_v53 = vpop.f32.mrf.mxu1 }
  0xe5   :  { %v440_v61 = vadd.f32 %v1928_v35, %v439_v57  ;;  %1324 = vst.msk [vmem:[%s2518_s3 + $0x28] sm:$0xf] %vm1313_vm1, %v1538_v54  ;;  %v1536_v2 = vpack.c.bf16 %v1001_v56, %v1001_v56  ;;  %v874_v6 = vsel %vm659_vm2, %v803_v55, 0.0  ;;  %v806_v7 = vmul.f32 %v448_v60, %v448_v60 }
  0xe6   :  { %v1647_v3 = vpop.f32.mrf.mxu0  ;;  %v676_v4 = vadd.f32 %v675_v1, %v674_v59  ;;  %v873_v5 = vadd.f32 %v872_v63, %v871_v58  ;;  %v1004_v10 = vmax.f32 %v448_v60, 0.0  ;;  %v681_v25 = vsel %vm659_vm2, %v448_v60, 0.0 }
  0xe7   :  { %1322 = vst.msk [vmem:[%s2518_s3 + $0x20] sm:$0xf] %vm1313_vm1, %v1536_v2  ;;  %v677_v11 = vsel %vm659_vm2, %v440_v61, 0.0  ;;  %v804_v12 = vmul.f32 %v440_v61, %v440_v61  ;;  %v1002_v13 = vmax.f32 %v440_v61, 0.0  ;;  %v461_v19 = vadd.f32 %v1647_v3, %v1928_v35 }
  0xe8   :  { %v452_v14 = vpop.f32.mrf.mxu0  ;;  %v875_v16 = vadd.f32 %v874_v6, %v873_v5  ;;  %v678_v18 = vadd.f32 %v677_v11, %v676_v4  ;;  %v1539_v20 = vpack.c.bf16 %v1004_v10, %v1004_v10  ;;  %v1027_v29 = vmax.f32 %v1978_v31, 0.0  ;;  %v2057_v11 = vpop.f32.mrf.mxu1 }
  0xe9   :  { %v876_v21 = vsel %vm659_vm2, %v804_v12, 0.0  ;;  %v1537_v22 = vpack.c.bf16 %v1002_v13, %v1002_v13  ;;  %v453_v23 = vadd.f32 %v1928_v35, %v452_v14  ;;  %v880_v32 = vsel %vm659_vm2, %v806_v7, 0.0 }
  0xea   :  { %v1648_v24 = vpop.f32.mrf.mxu0  ;;  %v680_v26 = vadd.f32 %v679_v0, %v678_v18  ;;  %v877_v28 = vadd.f32 %v876_v21, %v875_v16  ;;  %1325 = vst.msk [vmem:[%s2518_s3 + $0x2c] sm:$0xf] %vm1313_vm1, %v1539_v20  ;;  %v1007_v33 = vmax.f32 %v461_v19, 0.0  ;;  %v809_v40 = vmul.f32 %v461_v19, %v461_v19 }
  0xeb   :  { %1323 = vst.msk [vmem:[%s2518_s3 + $0x24] sm:$0xf] %vm1313_vm1, %v1537_v22  ;;  %v807_v34 = vmul.f32 %v453_v23, %v453_v23  ;;  %v1005_v36 = vmax.f32 %v453_v23, 0.0  ;;  %v464_v42 = vadd.f32 %v1648_v24, %v1928_v35  ;;  %v683_v44 = vsel %vm659_vm2, %v453_v23, 0.0 }
  0xec   :  { %v455_v37 = vpop.f32.mrf.mxu0  ;;  %v879_v39 = vadd.f32 %v878_v15, %v877_v28  ;;  %v682_v41 = vadd.f32 %v681_v25, %v680_v26  ;;  %v1542_v43 = vpack.c.bf16 %v1007_v33, %v1007_v33  ;;  %v687_v59 = vsel %vm659_vm2, %v461_v19, 0.0 }
  0xed   :  { %v1540_v45 = vpack.c.bf16 %v1005_v36, %v1005_v36  ;;  %v456_v46 = vadd.f32 %v1928_v35, %v455_v37  ;;  %v882_v50 = vsel %vm659_vm2, %v807_v34, 0.0  ;;  %v810_v51 = vmul.f32 %v464_v42, %v464_v42  ;;  %v2072_v36 = vpop.f32.mrf.mxu1 }
  0xee   :  { %v1651_v47 = vpop.f32.mrf.mxu0  ;;  %v684_v48 = vadd.f32 %v683_v44, %v682_v41  ;;  %v881_v49 = vadd.f32 %v880_v32, %v879_v39  ;;  %1328 = vst.msk [vmem:[%s2518_s3 + $0x38] sm:$0xf] %vm1313_vm1, %v1542_v43  ;;  %v1008_v54 = vmax.f32 %v464_v42, 0.0  ;;  %v886_v5 = vsel %vm659_vm2, %v809_v40, 0.0 }
  0xef   :  { %1326 = vst.msk [vmem:[%s2518_s3 + $0x30] sm:$0xf] %vm1313_vm1, %v1540_v45  ;;  %v685_v55 = vsel %vm659_vm2, %v456_v46, 0.0  ;;  %v808_v56 = vmul.f32 %v456_v46, %v456_v46  ;;  %v1006_v57 = vmax.f32 %v456_v46, 0.0  ;;  %v477_v63 = vadd.f32 %v1651_v47, %v1928_v35 }
  0xf0   :  { %v468_v58 = vpop.f32.mrf.mxu0  ;;  %v883_v60 = vadd.f32 %v882_v50, %v881_v49  ;;  %v686_v61 = vadd.f32 %v685_v55, %v684_v48  ;;  %v1543_v0 = vpack.c.bf16 %v1008_v54, %v1008_v54  ;;  %v689_v6 = vsel %vm659_vm2, %v464_v42, 0.0 }
  0xf1   :  { %v884_v1 = vsel %vm659_vm2, %v808_v56, 0.0  ;;  %v1541_v2 = vpack.c.bf16 %v1006_v57, %v1006_v57  ;;  %v469_v3 = vadd.f32 %v1928_v35, %v468_v58  ;;  %v888_v12 = vsel %vm659_vm2, %v810_v51, 0.0  ;;  %v2089_v58 = vpop.f32.mrf.mxu1 }
  0xf2   :  { %v1652_v4 = vpop.f32.mrf.mxu0  ;;  %v688_v7 = vadd.f32 %v687_v59, %v686_v61  ;;  %v885_v10 = vadd.f32 %v884_v1, %v883_v60  ;;  %1329 = vst.msk [vmem:[%s2518_s3 + $0x3c] sm:$0xf] %vm1313_vm1, %v1543_v0  ;;  %v1011_v13 = vmax.f32 %v477_v63, 0.0  ;;  %v813_v19 = vmul.f32 %v477_v63, %v477_v63 }
  0xf3   :  { %1327 = vst.msk [vmem:[%s2518_s3 + $0x34] sm:$0xf] %vm1313_vm1, %v1541_v2  ;;  %v811_v14 = vmul.f32 %v469_v3, %v469_v3  ;;  %v1009_v15 = vmax.f32 %v469_v3, 0.0  ;;  %v480_v21 = vadd.f32 %v1652_v4, %v1928_v35  ;;  %v691_v23 = vsel %vm659_vm2, %v469_v3, 0.0 }
  0xf4   :  { %v471_v16 = vpop.f32.mrf.mxu0  ;;  %v887_v18 = vadd.f32 %v886_v5, %v885_v10  ;;  %v690_v20 = vadd.f32 %v689_v6, %v688_v7  ;;  %v1546_v22 = vpack.c.bf16 %v1011_v13, %v1011_v13  ;;  %v695_v43 = vsel %vm659_vm2, %v477_v63, 0.0 }
  0xf5   :  { %v1544_v24 = vpack.c.bf16 %v1009_v15, %v1009_v15  ;;  %v472_v25 = vadd.f32 %v1928_v35, %v471_v16  ;;  %v890_v33 = vsel %vm659_vm2, %v811_v14, 0.0  ;;  %v814_v34 = vmul.f32 %v480_v21, %v480_v21 }
  0xf6   :  { %v1655_v26 = vpop.f32.mrf.mxu0  ;;  %v692_v28 = vadd.f32 %v691_v23, %v690_v20  ;;  %v889_v32 = vadd.f32 %v888_v12, %v887_v18  ;;  %1332 = vst.msk [vmem:[%s2518_s3 + $0x48] sm:$0xf] %vm1313_vm1, %v1546_v22  ;;  %v1012_v37 = vmax.f32 %v480_v21, 0.0  ;;  %v894_v54 = vsel %vm659_vm2, %v813_v19, 0.0  ;;  %v2104_v18 = vpop.f32.mrf.mxu1 }
  0xf7   :  { %1330 = vst.msk [vmem:[%s2518_s3 + $0x40] sm:$0xf] %vm1313_vm1, %v1544_v24  ;;  %v693_v39 = vsel %vm659_vm2, %v472_v25, 0.0  ;;  %v812_v40 = vmul.f32 %v472_v25, %v472_v25  ;;  %v1010_v41 = vmax.f32 %v472_v25, 0.0  ;;  %v493_v46 = vadd.f32 %v1655_v26, %v1928_v35 }
  0xf8   :  { %v484_v42 = vpop.f32.mrf.mxu0  ;;  %v891_v44 = vadd.f32 %v890_v33, %v889_v32  ;;  %v694_v45 = vadd.f32 %v693_v39, %v692_v28  ;;  %v1547_v47 = vpack.c.bf16 %v1012_v37, %v1012_v37  ;;  %v697_v55 = vsel %vm659_vm2, %v480_v21, 0.0 }
  0xf9   :  { %v892_v48 = vsel %vm659_vm2, %v812_v40, 0.0  ;;  %v1545_v49 = vpack.c.bf16 %v1010_v41, %v1010_v41  ;;  %v485_v50 = vadd.f32 %v1928_v35, %v484_v42  ;;  %v896_v59 = vsel %vm659_vm2, %v814_v34, 0.0 }
  0xfa   :  { %v1656_v51 = vpop.f32.mrf.mxu0  ;;  %v696_v56 = vadd.f32 %v695_v43, %v694_v45  ;;  %v893_v57 = vadd.f32 %v892_v48, %v891_v44  ;;  %1333 = vst.msk [vmem:[%s2518_s3 + $0x4c] sm:$0xf] %vm1313_vm1, %v1547_v47  ;;  %v1015_v60 = vmax.f32 %v493_v46, 0.0  ;;  %v817_v2 = vmul.f32 %v493_v46, %v493_v46  ;;  %v2121_v44 = vpop.f32.mrf.mxu1 }
  0xfb   :  { %1331 = vst.msk [vmem:[%s2518_s3 + $0x44] sm:$0xf] %vm1313_vm1, %v1545_v49  ;;  %v815_v61 = vmul.f32 %v485_v50, %v485_v50  ;;  %v1013_v63 = vmax.f32 %v485_v50, 0.0  ;;  %v496_v4 = vadd.f32 %v1656_v51, %v1928_v35  ;;  %v699_v6 = vsel %vm659_vm2, %v485_v50, 0.0 }
  0xfc   :  { %v487_v0 = vpop.f32.mrf.mxu0  ;;  %v895_v1 = vadd.f32 %v894_v54, %v893_v57  ;;  %v698_v3 = vadd.f32 %v697_v55, %v696_v56  ;;  %v1550_v5 = vpack.c.bf16 %v1015_v60, %v1015_v60  ;;  %v703_v24 = vsel %vm659_vm2, %v493_v46, 0.0 }
  0xfd   :  { %v1548_v7 = vpack.c.bf16 %v1013_v63, %v1013_v63  ;;  %v488_v10 = vadd.f32 %v1928_v35, %v487_v0  ;;  %v898_v15 = vsel %vm659_vm2, %v815_v61, 0.0  ;;  %v818_v16 = vmul.f32 %v496_v4, %v496_v4 }
  0xfe   :  { %v1659_v12 = vpop.f32.mrf.mxu0  ;;  %v700_v13 = vadd.f32 %v699_v6, %v698_v3  ;;  %v897_v14 = vadd.f32 %v896_v59, %v895_v1  ;;  %1336 = vst.msk [vmem:[%s2518_s3 + $0x58] sm:$0xf] %vm1313_vm1, %v1550_v5  ;;  %v1016_v19 = vmax.f32 %v496_v4, 0.0  ;;  %v902_v40 = vsel %vm659_vm2, %v817_v2, 0.0  ;;  %v2137_v3 = vpop.f32.mrf.mxu1 }
  0xff   :  { %1334 = vst.msk [vmem:[%s2518_s3 + $0x50] sm:$0xf] %vm1313_vm1, %v1548_v7  ;;  %v701_v20 = vsel %vm659_vm2, %v488_v10, 0.0  ;;  %v816_v21 = vmul.f32 %v488_v10, %v488_v10  ;;  %v1014_v22 = vmax.f32 %v488_v10, 0.0  ;;  %v509_v28 = vadd.f32 %v1659_v12, %v1928_v35 }
 0x100   :  { %v500_v23 = vpop.f32.mrf.mxu0  ;;  %v899_v25 = vadd.f32 %v898_v15, %v897_v14  ;;  %v702_v26 = vadd.f32 %v701_v20, %v700_v13  ;;  %v1551_v32 = vpack.c.bf16 %v1016_v19, %v1016_v19  ;;  %v705_v41 = vsel %vm659_vm2, %v496_v4, 0.0 }
 0x101   :  { %v900_v33 = vsel %vm659_vm2, %v816_v21, 0.0  ;;  %v1549_v34 = vpack.c.bf16 %v1014_v22, %v1014_v22  ;;  %v501_v37 = vadd.f32 %v1928_v35, %v500_v23  ;;  %v904_v45 = vsel %vm659_vm2, %v818_v16, 0.0 }
 0x102   :  { %v1660_v39 = vpop.f32.mrf.mxu0  ;;  %v704_v42 = vadd.f32 %v703_v24, %v702_v26  ;;  %v901_v43 = vadd.f32 %v900_v33, %v899_v25  ;;  %1337 = vst.msk [vmem:[%s2518_s3 + $0x5c] sm:$0xf] %vm1313_vm1, %v1551_v32  ;;  %v1019_v46 = vmax.f32 %v509_v28, 0.0  ;;  %v711_v51 = vsel %vm659_vm2, %v509_v28, 0.0  ;;  %v2153_v26 = vpop.f32.mrf.mxu1 }
 0x103   :  { %1335 = vst.msk [vmem:[%s2518_s3 + $0x54] sm:$0xf] %vm1313_vm1, %v1549_v34  ;;  %v819_v47 = vmul.f32 %v501_v37, %v501_v37  ;;  %v1017_v48 = vmax.f32 %v501_v37, 0.0  ;;  %v512_v55 = vadd.f32 %v1660_v39, %v1928_v35  ;;  %v707_v57 = vsel %vm659_vm2, %v501_v37, 0.0 }
 0x104   :  { %v503_v49 = vpop.f32.mrf.mxu0  ;;  %v903_v50 = vadd.f32 %v902_v40, %v901_v43  ;;  %v706_v54 = vadd.f32 %v705_v41, %v704_v42  ;;  %v1554_v56 = vpack.c.bf16 %v1019_v46, %v1019_v46  ;;  %v821_v63 = vmul.f32 %v509_v28, %v509_v28 }
 0x105   :  { %v1552_v59 = vpack.c.bf16 %v1017_v48, %v1017_v48  ;;  %v504_v60 = vadd.f32 %v1928_v35, %v503_v49  ;;  %v906_v2 = vsel %vm659_vm2, %v819_v47, 0.0  ;;  %v1020_v4 = vmax.f32 %v512_v55, 0.0  ;;  %v2175_v49 = vpop.f32.mrf.mxu1 }
 0x106   :  { %v1663_v61 = vpop.f32.mrf.mxu0  ;;  %v708_v0 = vadd.f32 %v707_v57, %v706_v54  ;;  %v905_v1 = vadd.f32 %v904_v45, %v903_v50  ;;  %1340 = vst.msk [vmem:[%s2518_s3 + $0x68] sm:$0xf] %vm1313_vm1, %v1554_v56  ;;  %v822_v13 = vmul.f32 %v512_v55, %v512_v55  ;;  %v533_v25 = vadd.f32 %v1928_v35, %v1945_v62 }
 0x107   :  { %1338 = vst.msk [vmem:[%s2518_s3 + $0x60] sm:$0xf] %vm1313_vm1, %v1552_v59  ;;  %v709_v5 = vsel %vm659_vm2, %v504_v60, 0.0  ;;  %v820_v6 = vmul.f32 %v504_v60, %v504_v60  ;;  %v1018_v7 = vmax.f32 %v504_v60, 0.0  ;;  %v525_v15 = vadd.f32 %v1663_v61, %v1928_v35 }
 0x108   :  { %v516_v10 = vpop.f32.mrf.mxu0  ;;  %v907_v12 = vadd.f32 %v906_v2, %v905_v1  ;;  %v710_v14 = vadd.f32 %v709_v5, %v708_v0  ;;  %v1555_v16 = vpack.c.bf16 %v1020_v4, %v1020_v4  ;;  %v910_v28 = vsel %vm659_vm2, %v821_v63, 0.0  ;;  %v2192_v4 = vpop.f32.mrf.mxu1 }
 0x109   :  { %v908_v19 = vsel %vm659_vm2, %v820_v6, 0.0  ;;  %v1553_v20 = vpack.c.bf16 %v1018_v7, %v1018_v7  ;;  %v517_v21 = vadd.f32 %v1928_v35, %v516_v10  ;;  %v713_v32 = vsel %vm659_vm2, %v512_v55, 0.0 }
 0x10a   :  { %v1664_v22 = vpop.f32.mrf.mxu0  ;;  %v712_v23 = vadd.f32 %v711_v51, %v710_v14  ;;  %v909_v24 = vadd.f32 %v908_v19, %v907_v12  ;;  %1341 = vst.msk [vmem:[%s2518_s3 + $0x6c] sm:$0xf] %vm1313_vm1, %v1555_v16  ;;  %v1023_v33 = vmax.f32 %v525_v15, 0.0  ;;  %v1562_v40 = vpack.c.bf16 %v1027_v29, %v1027_v29 }
 0x10b   :  { %1339 = vst.msk [vmem:[%s2518_s3 + $0x64] sm:$0xf] %vm1313_vm1, %v1553_v20  ;;  %v1021_v34 = vmax.f32 %v517_v21, 0.0  ;;  %v823_v39 = vmul.f32 %v517_v21, %v517_v21  ;;  %v912_v41 = vsel %vm659_vm2, %v822_v13, 0.0  ;;  %v528_v45 = vadd.f32 %v1664_v22, %v1928_v35 }
 0x10c   :  { %v911_v37 = vadd.f32 %v910_v28, %v909_v24  ;;  %v714_v62 = vadd.f32 %v713_v32, %v712_v23  ;;  %v1558_v42 = vpack.c.bf16 %v1023_v33, %v1023_v33  ;;  %v519_v46 = vpop.f32.mrf.mxu0  ;;  %v715_v47 = vsel %vm659_vm2, %v517_v21, 0.0  ;;  %1348 = vst.msk [vmem:[%s2518_s3 + $0x88] sm:$0xf] %vm1313_vm1, %v1562_v40  ;;  %v2214_v24 = vpop.f32.mrf.mxu1 }
 0x10d   :  { %v1556_v43 = vpack.c.bf16 %v1021_v34, %v1021_v34  ;;  %v825_v50 = vmul.f32 %v525_v15, %v525_v15  ;;  %v1024_v51 = vmax.f32 %v528_v45, 0.0  ;;  %v1025_v54 = vmax.f32 %v533_v25, 0.0 }
 0x10e   :  { %v913_v48 = vadd.f32 %v912_v41, %v911_v37  ;;  %1344 = vst.msk [vmem:[%s2518_s3 + $0x78] sm:$0xf] %vm1313_vm1, %v1558_v42  ;;  %v716_v29 = vadd.f32 %v715_v47, %v714_v62  ;;  %v914_v55 = vsel %vm659_vm2, %v823_v39, 0.0  ;;  %v520_v56 = vadd.f32 %v1928_v35, %v519_v46  ;;  %v2234_v47 = vpop.f32.mrf.mxu1 }
 0x10f   :  { %1342 = vst.msk [vmem:[%s2518_s3 + $0x70] sm:$0xf] %vm1313_vm1, %v1556_v43  ;;  %v544_v57 = vadd.f32 %v1955_v8, %v1928_v35  ;;  %v1559_v60 = vpack.c.bf16 %v1024_v51, %v1024_v51  ;;  %v1560_v61 = vpack.c.bf16 %v1025_v54, %v1025_v54  ;;  %v536_v63 = vadd.f32 %v1928_v35, %v1965_v17 }
 0x110   :  { %v915_v59 = vadd.f32 %v914_v55, %v913_v48  ;;  %v717_v0 = vsel %vm659_vm2, %v520_v56, 0.0  ;;  %v824_v1 = vmul.f32 %v520_v56, %v520_v56  ;;  %v1022_v2 = vmax.f32 %v520_v56, 0.0 }
 0x111   :  { %v719_v5 = vsel %vm659_vm2, %v525_v15, 0.0  ;;  %v918_v6 = vsel %vm659_vm2, %v825_v50, 0.0  ;;  %1345 = vst.msk [vmem:[%s2518_s3 + $0x7c] sm:$0xf] %vm1313_vm1, %v1559_v60  ;;  %1346 = vst.msk [vmem:[%s2518_s3 + $0x80] sm:$0xf] %vm1313_vm1, %v1560_v61  ;;  %v718_v8 = vadd.f32 %v717_v0, %v716_v29  ;;  %v826_v7 = vmul.f32 %v528_v45, %v528_v45 }
 0x112   :  { %v1028_v17 = vmax.f32 %v544_v57, 0.0  ;;  %v916_v10 = vsel %vm659_vm2, %v824_v1, 0.0  ;;  %v1557_v12 = vpack.c.bf16 %v1022_v2, %v1022_v2  ;;  %v1026_v13 = vmax.f32 %v536_v63, 0.0  ;;  %v2254_v1 = vpop.f32.mrf.mxu1 }
 0x113   :  { %v827_v14 = vmul.f32 %v533_v25, %v533_v25  ;;  %v720_v15 = vadd.f32 %v719_v5, %v718_v8  ;;  %v917_v16 = vadd.f32 %v916_v10, %v915_v59  ;;  %v721_v20 = vsel %vm659_vm2, %v528_v45, 0.0 }
 0x114   :  { %v1563_v19 = vpack.c.bf16 %v1028_v17, %v1028_v17  ;;  %1343 = vst.msk [vmem:[%s2518_s3 + $0x74] sm:$0xf] %vm1313_vm1, %v1557_v12  ;;  %v1561_v21 = vpack.c.bf16 %v1026_v13, %v1026_v13  ;;  %v557_v22 = vadd.f32 %v1973_v27, %v1928_v35  ;;  %v549_v23 = vadd.f32 %v1928_v35, %v1981_v38 }
 0x115   :  { %v829_v28 = vmul.f32 %v1978_v31, %v1978_v31  ;;  %v723_v32 = vsel %vm659_vm2, %v533_v25, 0.0  ;;  %v919_v33 = vadd.f32 %v918_v6, %v917_v16  ;;  %v722_v34 = vadd.f32 %v721_v20, %v720_v15  ;;  %v2272_v20 = vpop.f32.mrf.mxu1 }
 0x116   :  { %1349 = vst.msk [vmem:[%s2518_s3 + $0x8c] sm:$0xf] %vm1313_vm1, %v1563_v19  ;;  %v920_v37 = vsel %vm659_vm2, %v826_v7, 0.0  ;;  %v828_v27 = vmul.f32 %v536_v63, %v536_v63  ;;  %1347 = vst.msk [vmem:[%s2518_s3 + $0x84] sm:$0xf] %vm1313_vm1, %v1561_v21  ;;  %v1031_v38 = vmax.f32 %v557_v22, 0.0  ;;  %v560_v62 = vadd.f32 %v1996_v52, %v1928_v35 }
 0x117   :  { %v724_v25 = vadd.f32 %v723_v32, %v722_v34  ;;  %v921_v39 = vadd.f32 %v920_v37, %v919_v33  ;;  %v1029_v40 = vmax.f32 %v549_v23, 0.0  ;;  %v552_v41 = vadd.f32 %v1928_v35, %v2012_v9 }
 0x118   :  { %v922_v42 = vsel %vm659_vm2, %v827_v14, 0.0  ;;  %v830_v43 = vmul.f32 %v544_v57, %v544_v57  ;;  %v725_v45 = vsel %vm659_vm2, %v536_v63, 0.0  ;;  %v1566_v46 = vpack.c.bf16 %v1031_v38, %v1031_v38 }
 0x119   :  { %v727_v48 = vsel %vm659_vm2, %v1978_v31, 0.0  ;;  %v726_v50 = vadd.f32 %v725_v45, %v724_v25  ;;  %v923_v29 = vadd.f32 %v922_v42, %v921_v39  ;;  %v1564_v52 = vpack.c.bf16 %v1029_v40, %v1029_v40 }
 0x11a   :  { %v926_v51 = vsel %vm659_vm2, %v829_v28, 0.0  ;;  %v729_v54 = vsel %vm659_vm2, %v544_v57, 0.0  ;;  %v924_v9 = vsel %vm659_vm2, %v828_v27, 0.0  ;;  %1352 = vst.msk [vmem:[%s2518_s3 + $0x98] sm:$0xf] %vm1313_vm1, %v1566_v46  ;;  %v1032_v55 = vmax.f32 %v560_v62, 0.0 }
 0x11b   :  { %v728_v56 = vadd.f32 %v727_v48, %v726_v50  ;;  %v925_v59 = vadd.f32 %v924_v9, %v923_v29  ;;  %1350 = vst.msk [vmem:[%s2518_s3 + $0x90] sm:$0xf] %vm1313_vm1, %v1564_v52  ;;  %v1030_v31 = vmax.f32 %v552_v41, 0.0  ;;  %v573_v60 = vadd.f32 %v2025_v30, %v1928_v35 }
 0x11c   :  { %v928_v57 = vsel %vm659_vm2, %v830_v43, 0.0  ;;  %v831_v61 = vmul.f32 %v549_v23, %v549_v23  ;;  %v1567_v63 = vpack.c.bf16 %v1032_v55, %v1032_v55  ;;  %v565_v0 = vadd.f32 %v1928_v35, %v2040_v53  ;;  %v2295_v43 = vpop.f32.mrf.mxu1 }
 0x11d   :  { %v927_v2 = vadd.f32 %v926_v51, %v925_v59  ;;  %v730_v5 = vadd.f32 %v729_v54, %v728_v56  ;;  %v1565_v6 = vpack.c.bf16 %v1030_v31, %v1030_v31  ;;  %v2258_v8 = vadd.f32 %v2057_v11, %v1928_v35 }
 0x11e   :  { %v833_v17 = vmul.f32 %v557_v22, %v557_v22  ;;  %v731_v7 = vsel %vm659_vm2, %v549_v23, 0.0  ;;  %1353 = vst.msk [vmem:[%s2518_s3 + $0x9c] sm:$0xf] %vm1313_vm1, %v1567_v63  ;;  %v832_v30 = vmul.f32 %v552_v41, %v552_v41  ;;  %v1035_v10 = vmax.f32 %v573_v60, 0.0  ;;  %v2316_v31 = vpop.f32.mrf.mxu1 }
 0x11f   :  { %v735_v53 = vsel %vm659_vm2, %v557_v22, 0.0  ;;  %v732_v12 = vadd.f32 %v731_v7, %v730_v5  ;;  %v929_v13 = vadd.f32 %v928_v57, %v927_v2  ;;  %1351 = vst.msk [vmem:[%s2518_s3 + $0x94] sm:$0xf] %vm1313_vm1, %v1565_v6  ;;  %v1033_v11 = vmax.f32 %v565_v0, 0.0 }
 0x120   :  { %v930_v14 = vsel %vm659_vm2, %v831_v61, 0.0  ;;  %v834_v15 = vmul.f32 %v560_v62, %v560_v62  ;;  %v733_v16 = vsel %vm659_vm2, %v552_v41, 0.0  ;;  %v1570_v19 = vpack.c.bf16 %v1035_v10, %v1035_v10 }
 0x121   :  { %v931_v21 = vadd.f32 %v930_v14, %v929_v13  ;;  %v734_v23 = vadd.f32 %v733_v16, %v732_v12  ;;  %v1568_v28 = vpack.c.bf16 %v1033_v11, %v1033_v11  ;;  %v1036_v22 = vmax.f32 %v2258_v8, 0.0  ;;  %v2340_v13 = vpop.f32.mrf.mxu1 }
 0x122   :  { %v934_v32 = vsel %vm659_vm2, %v833_v17, 0.0  ;;  %v932_v33 = vsel %vm659_vm2, %v832_v30, 0.0  ;;  %1356 = vst.msk [vmem:[%s2518_s3 + $0xa8] sm:$0xf] %vm1313_vm1, %v1570_v19  ;;  %v568_v34 = vadd.f32 %v1928_v35, %v2072_v36  ;;  %v2285_v37 = vadd.f32 %v2089_v58, %v1928_v35 }
 0x123   :  { %v737_v27 = vsel %vm659_vm2, %v560_v62, 0.0  ;;  %v736_v38 = vadd.f32 %v735_v53, %v734_v23  ;;  %v933_v25 = vadd.f32 %v932_v33, %v931_v21  ;;  %1354 = vst.msk [vmem:[%s2518_s3 + $0xa0] sm:$0xf] %vm1313_vm1, %v1568_v28  ;;  %v1571_v39 = vpack.c.bf16 %v1036_v22, %v1036_v22 }
 0x124   :  { %v936_v40 = vsel %vm659_vm2, %v834_v15, 0.0  ;;  %v835_v41 = vmul.f32 %v565_v0, %v565_v0  ;;  %v1034_v42 = vmax.f32 %v568_v34, 0.0  ;;  %v581_v36 = vadd.f32 %v1928_v35, %v2104_v18 }
 0x125   :  { %v935_v58 = vadd.f32 %v934_v32, %v933_v25  ;;  %v738_v45 = vadd.f32 %v737_v27, %v736_v38  ;;  %1357 = vst.msk [vmem:[%s2518_s3 + $0xac] sm:$0xf] %vm1313_vm1, %v1571_v39  ;;  %v1039_v62 = vmax.f32 %v2285_v37, 0.0  ;;  %v2304_v46 = vadd.f32 %v2121_v44, %v1928_v35  ;;  %v2362_v25 = vpop.f32.mrf.mxu1 }
 0x126   :  { %v743_v48 = vsel %vm659_vm2, %v573_v60, 0.0  ;;  %v739_v50 = vsel %vm659_vm2, %v565_v0, 0.0  ;;  %v836_v18 = vmul.f32 %v568_v34, %v568_v34  ;;  %v1569_v29 = vpack.c.bf16 %v1034_v42, %v1034_v42 }
 0x127   :  { %v837_v52 = vmul.f32 %v573_v60, %v573_v60  ;;  %v740_v51 = vadd.f32 %v739_v50, %v738_v45  ;;  %v937_v54 = vadd.f32 %v936_v40, %v935_v58  ;;  %v1574_v9 = vpack.c.bf16 %v1039_v62, %v1039_v62 }
 0x128   :  { %v938_v55 = vsel %vm659_vm2, %v835_v41, 0.0  ;;  %v838_v56 = vmul.f32 %v2258_v8, %v2258_v8  ;;  %v741_v59 = vsel %vm659_vm2, %v568_v34, 0.0  ;;  %1355 = vst.msk [vmem:[%s2518_s3 + $0xa4] sm:$0xf] %vm1313_vm1, %v1569_v29  ;;  %v1037_v44 = vmax.f32 %v581_v36, 0.0 }
 0x129   :  { %v939_v57 = vadd.f32 %v938_v55, %v937_v54  ;;  %v742_v60 = vadd.f32 %v741_v59, %v740_v51  ;;  %1360 = vst.msk [vmem:[%s2518_s3 + $0xb8] sm:$0xf] %vm1313_vm1, %v1574_v9  ;;  %v1040_v61 = vmax.f32 %v2304_v46, 0.0  ;;  %v584_v63 = vadd.f32 %v1928_v35, %v2137_v3 }
 0x12a   :  { %v940_v0 = vsel %vm659_vm2, %v836_v18, 0.0  ;;  %v839_v2 = vmul.f32 %v581_v36, %v581_v36  ;;  %v1572_v5 = vpack.c.bf16 %v1037_v44, %v1037_v44  ;;  %v2328_v6 = vadd.f32 %v2153_v26, %v1928_v35 }
 0x12b   :  { %v744_v17 = vadd.f32 %v743_v48, %v742_v60  ;;  %v941_v7 = vadd.f32 %v940_v0, %v939_v57  ;;  %v1575_v30 = vpack.c.bf16 %v1040_v61, %v1040_v61  ;;  %v597_v10 = vadd.f32 %v1928_v35, %v2175_v49  ;;  %v2401_v60 = vld [vmem:[%s2517_s2] ss:$0 sm:$0xff] }
 0x12c   :  { %v942_v53 = vsel %vm659_vm2, %v837_v52, 0.0  ;;  %v745_v12 = vsel %vm659_vm2, %v2258_v8, 0.0  ;;  %v944_v3 = vsel %vm659_vm2, %v838_v56, 0.0  ;;  %1358 = vst.msk [vmem:[%s2518_s3 + $0xb0] sm:$0xf] %vm1313_vm1, %v1572_v5  ;;  %v1038_v26 = vmax.f32 %v584_v63, 0.0  ;;  %v631_v52 = vpop.f32.mrf.mxu1 }
 0x12d   :  { %v943_v11 = vadd.f32 %v942_v53, %v941_v7  ;;  %v841_v14 = vmul.f32 %v2285_v37, %v2285_v37  ;;  %v746_v49 = vadd.f32 %v745_v12, %v744_v17  ;;  %1361 = vst.msk [vmem:[%s2518_s3 + $0xbc] sm:$0xf] %vm1313_vm1, %v1575_v30  ;;  %v1043_v8 = vmax.f32 %v2328_v6, 0.0 }
 0x12e   :  { %v747_v15 = vsel %vm659_vm2, %v581_v36, 0.0  ;;  %v946_v16 = vsel %vm659_vm2, %v839_v2, 0.0  ;;  %v840_v19 = vmul.f32 %v584_v63, %v584_v63  ;;  %v1573_v21 = vpack.c.bf16 %v1038_v26, %v1038_v26  ;;  %v1695_v17 = vpop.f32.mrf.mxu1 }
 0x12f   :  { %v748_v23 = vadd.f32 %v747_v15, %v746_v49  ;;  %v945_v28 = vadd.f32 %v944_v3, %v943_v11  ;;  %v1578_v22 = vpack.c.bf16 %v1043_v8, %v1043_v8  ;;  %v1041_v32 = vmax.f32 %v597_v10, 0.0 }
 0x130   :  { %v842_v33 = vmul.f32 %v2304_v46, %v2304_v46  ;;  %v749_v34 = vsel %vm659_vm2, %v584_v63, 0.0  ;;  %1359 = vst.msk [vmem:[%s2518_s3 + $0xb4] sm:$0xf] %vm1313_vm1, %v1573_v21  ;;  %v608_v27 = vadd.f32 %v2192_v4, %v1928_v35  ;;  %v600_v38 = vadd.f32 %v1928_v35, %v2214_v24 }
 0x131   :  { %v751_v39 = vsel %vm659_vm2, %v2285_v37, 0.0  ;;  %v947_v40 = vadd.f32 %v946_v16, %v945_v28  ;;  %v750_v41 = vadd.f32 %v749_v34, %v748_v23  ;;  %1364 = vst.msk [vmem:[%s2518_s3 + $0xc8] sm:$0xf] %vm1313_vm1, %v1578_v22  ;;  %v1576_v42 = vpack.c.bf16 %v1041_v32, %v1041_v32  ;;  %v644_v16 = vpop.f32.mrf.mxu1 }
 0x132   :  { %v948_v36 = vsel %vm659_vm2, %v840_v19, 0.0  ;;  %v843_v58 = vmul.f32 %v597_v10, %v597_v10  ;;  %v1044_v4 = vmax.f32 %v608_v27, 0.0  ;;  %v2373_v24 = vadd.f32 %v2234_v47, %v1928_v35 }
 0x133   :  { %v752_v45 = vadd.f32 %v751_v39, %v750_v41  ;;  %v949_v62 = vadd.f32 %v948_v36, %v947_v40  ;;  %1362 = vst.msk [vmem:[%s2518_s3 + $0xc0] sm:$0xf] %vm1313_vm1, %v1576_v42  ;;  %v1042_v37 = vmax.f32 %v600_v38, 0.0  ;;  %v613_v48 = vadd.f32 %v1928_v35, %v2254_v1 }
 0x134   :  { %v950_v50 = vsel %vm659_vm2, %v841_v14, 0.0  ;;  %v753_v18 = vsel %vm659_vm2, %v2304_v46, 0.0  ;;  %v952_v29 = vsel %vm659_vm2, %v842_v33, 0.0  ;;  %v1579_v47 = vpack.c.bf16 %v1044_v4, %v1044_v4 }
 0x135   :  { %v951_v51 = vadd.f32 %v950_v50, %v949_v62  ;;  %v845_v54 = vmul.f32 %v2328_v6, %v2328_v6  ;;  %v754_v9 = vadd.f32 %v753_v18, %v752_v45  ;;  %v1577_v55 = vpack.c.bf16 %v1042_v37, %v1042_v37 }
 0x136   :  { %v755_v56 = vsel %vm659_vm2, %v597_v10, 0.0  ;;  %v954_v59 = vsel %vm659_vm2, %v843_v58, 0.0  ;;  %1365 = vst.msk [vmem:[%s2518_s3 + $0xcc] sm:$0xf] %vm1313_vm1, %v1579_v47  ;;  %v844_v35 = vmul.f32 %v600_v38, %v600_v38  ;;  %v1047_v1 = vmax.f32 %v2373_v24, 0.0 }
 0x137   :  { %v756_v46 = vadd.f32 %v755_v56, %v754_v9  ;;  %v953_v44 = vadd.f32 %v952_v29, %v951_v51  ;;  %1363 = vst.msk [vmem:[%s2518_s3 + $0xc4] sm:$0xf] %vm1313_vm1, %v1577_v55  ;;  %v1045_v57 = vmax.f32 %v613_v48, 0.0  ;;  %v624_v61 = vadd.f32 %v2401_v60, %v2272_v20 }
 0x138   :  { %v846_v63 = vmul.f32 %v608_v27, %v608_v27  ;;  %v757_v0 = vsel %vm659_vm2, %v600_v38, 0.0  ;;  %v1582_v2 = vpack.c.bf16 %v1047_v1, %v1047_v1  ;;  %v616_v5 = vadd.f32 %v2401_v60, %v2295_v43 }
 0x139   :  { %v955_v7 = vadd.f32 %v954_v59, %v953_v44  ;;  %v758_v30 = vadd.f32 %v757_v0, %v756_v46  ;;  %v1580_v10 = vpack.c.bf16 %v1045_v57, %v1045_v57  ;;  %v2410_v53 = vadd.f32 %v2401_v60, %v2316_v31 }
 0x13a   :  { %v759_v12 = vsel %vm659_vm2, %v2328_v6, 0.0  ;;  %v958_v20 = vsel %vm659_vm2, %v845_v54, 0.0  ;;  %v956_v3 = vsel %vm659_vm2, %v844_v35, 0.0  ;;  %1368 = vst.msk [vmem:[%s2518_s3 + $0xd8] sm:$0xf] %vm1313_vm1, %v1582_v2  ;;  %v1048_v43 = vmax.f32 %v624_v61, 0.0 }
 0x13b   :  { %v760_v26 = vadd.f32 %v759_v12, %v758_v30  ;;  %v957_v11 = vadd.f32 %v956_v3, %v955_v7  ;;  %v847_v14 = vmul.f32 %v613_v48, %v613_v48  ;;  %1366 = vst.msk [vmem:[%s2518_s3 + $0xd0] sm:$0xf] %vm1313_vm1, %v1580_v10  ;;  %v1046_v31 = vmax.f32 %v616_v5, 0.0 }
 0x13c   :  { %v761_v6 = vsel %vm659_vm2, %v608_v27, 0.0  ;;  %v960_v49 = vsel %vm659_vm2, %v846_v63, 0.0  ;;  %v849_v8 = vmul.f32 %v2373_v24, %v2373_v24  ;;  %v1583_v15 = vpack.c.bf16 %v1048_v43, %v1048_v43 }
 0x13d   :  { %v959_v19 = vadd.f32 %v958_v20, %v957_v11  ;;  %v762_v21 = vadd.f32 %v761_v6, %v760_v26  ;;  %v1581_v23 = vpack.c.bf16 %v1046_v31, %v1046_v31  ;;  %v1051_v28 = vmax.f32 %v2410_v53, 0.0 }
 0x13e   :  { %v763_v22 = vsel %vm659_vm2, %v613_v48, 0.0  ;;  %1369 = vst.msk [vmem:[%s2518_s3 + $0xdc] sm:$0xf] %vm1313_vm1, %v1583_v15  ;;  %v848_v32 = vmul.f32 %v616_v5, %v616_v5  ;;  %v629_v33 = vadd.f32 %v2401_v60, %v2340_v13  ;;  %v640_v34 = vadd.f32 %v2401_v60, %v2362_v25  ;;  %v1696_v13 = vpop.f32.mrf.mxu1 }
 0x13f   :  { %v764_v27 = vadd.f32 %v763_v22, %v762_v21  ;;  %v961_v38 = vadd.f32 %v960_v49, %v959_v19  ;;  %v962_v39 = vsel %vm659_vm2, %v847_v14, 0.0  ;;  %1367 = vst.msk [vmem:[%s2518_s3 + $0xd4] sm:$0xf] %vm1313_vm1, %v1581_v23  ;;  %v1586_v40 = vpack.c.bf16 %v1051_v28, %v1051_v28 }
 0x140   :  { %v850_v41 = vmul.f32 %v624_v61, %v624_v61  ;;  %v765_v42 = vsel %vm659_vm2, %v616_v5, 0.0  ;;  %v1049_v36 = vmax.f32 %v629_v33, 0.0  ;;  %v632_v58 = vadd.f32 %v2401_v60, %v631_v52 }
 0x141   :  { %v963_v4 = vadd.f32 %v962_v39, %v961_v38  ;;  %v766_v45 = vadd.f32 %v765_v42, %v764_v27  ;;  %1372 = vst.msk [vmem:[%s2518_s3 + $0xe8] sm:$0xf] %vm1313_vm1, %v1586_v40  ;;  %v1052_v25 = vmax.f32 %v640_v34, 0.0  ;;  %v2450_v62 = vadd.f32 %v2401_v60, %v1695_v17 }
 0x142   :  { %v767_v37 = vsel %vm659_vm2, %v2373_v24, 0.0  ;;  %v964_v48 = vsel %vm659_vm2, %v848_v32, 0.0  ;;  %v1584_v50 = vpack.c.bf16 %v1049_v36, %v1049_v36  ;;  %v966_v18 = vsel %vm659_vm2, %v849_v8, 0.0  ;;  %v647_v24 = vpop.f32.mrf.mxu1 }
 0x143   :  { %v768_v29 = vadd.f32 %v767_v37, %v766_v45  ;;  %v965_v47 = vadd.f32 %v964_v48, %v963_v4  ;;  %v1587_v52 = vpack.c.bf16 %v1052_v25, %v1052_v25  ;;  %v769_v51 = vsel %vm659_vm2, %v624_v61, 0.0 }
 0x144   :  { %v968_v54 = vsel %vm659_vm2, %v850_v41, 0.0  ;;  %v851_v9 = vmul.f32 %v629_v33, %v629_v33  ;;  %1370 = vst.msk [vmem:[%s2518_s3 + $0xe0] sm:$0xf] %vm1313_vm1, %v1584_v50  ;;  %v1050_v55 = vmax.f32 %v632_v58, 0.0  ;;  %v1055_v35 = vmax.f32 %v2450_v62, 0.0 }
 0x145   :  { %v967_v56 = vadd.f32 %v966_v18, %v965_v47  ;;  %v770_v59 = vadd.f32 %v769_v51, %v768_v29  ;;  %1373 = vst.msk [vmem:[%s2518_s3 + $0xec] sm:$0xf] %vm1313_vm1, %v1587_v52  ;;  %v645_v1 = vadd.f32 %v2401_v60, %v644_v16  ;;  %v771_v46 = vsel %vm659_vm2, %v629_v33, 0.0 }
 0x146   :  { %v852_v44 = vmul.f32 %v632_v58, %v632_v58  ;;  %v1585_v57 = vpack.c.bf16 %v1050_v55, %v1050_v55  ;;  %v656_v61 = vadd.f32 %v2401_v60, %v1696_v13  ;;  %v1590_v2 = vpack.c.bf16 %v1055_v35, %v1055_v35 }
 0x147   :  { %v772_v63 = vadd.f32 %v771_v46, %v770_v59  ;;  %v969_v0 = vadd.f32 %v968_v54, %v967_v56  ;;  %v648_v5 = vadd.f32 %v2401_v60, %v647_v24  ;;  %v853_v17 = vmul.f32 %v2410_v53, %v2410_v53 }
 0x148   :  { %v970_v7 = vsel %vm659_vm2, %v851_v9, 0.0  ;;  %v773_v30 = vsel %vm659_vm2, %v632_v58, 0.0  ;;  %1371 = vst.msk [vmem:[%s2518_s3 + $0xe4] sm:$0xf] %vm1313_vm1, %v1585_v57  ;;  %v1053_v10 = vmax.f32 %v645_v1, 0.0  ;;  %v1056_v60 = vmax.f32 %v656_v61, 0.0 }
 0x149   :  { %v971_v12 = vadd.f32 %v970_v7, %v969_v0  ;;  %v774_v20 = vadd.f32 %v773_v30, %v772_v63  ;;  %1376 = vst.msk [vmem:[%s2518_s3 + $0xf8] sm:$0xf] %vm1313_vm1, %v1590_v2  ;;  %v775_v3 = vsel %vm659_vm2, %v2410_v53, 0.0  ;;  %v854_v43 = vmul.f32 %v640_v34, %v640_v34 }
 0x14a   :  { %v972_v26 = vsel %vm659_vm2, %v852_v44, 0.0  ;;  %v1588_v11 = vpack.c.bf16 %v1053_v10, %v1053_v10  ;;  %v1591_v6 = vpack.c.bf16 %v1056_v60, %v1056_v60  ;;  %v1054_v49 = vmax.f32 %v648_v5, 0.0 }
 0x14b   :  { %v776_v14 = vadd.f32 %v775_v3, %v774_v20  ;;  %v973_v31 = vadd.f32 %v972_v26, %v971_v12  ;;  %v974_v8 = vsel %vm659_vm2, %v853_v17, 0.0  ;;  %v777_v15 = vsel %vm659_vm2, %v640_v34, 0.0 }
 0x14c   :  { %v855_v16 = vmul.f32 %v645_v1, %v645_v1  ;;  %1374 = vst.msk [vmem:[%s2518_s3 + $0xf0] sm:$0xf] %vm1313_vm1, %v1588_v11  ;;  %1377 = vst.msk [vmem:[%s2518_s3 + $0xfc] sm:$0xf] %vm1313_vm1, %v1591_v6  ;;  %v1589_v21 = vpack.c.bf16 %v1054_v49, %v1054_v49  ;;  %v976_v23 = vsel %vm659_vm2, %v854_v43, 0.0  ;;  %v779_v28 = vsel %vm659_vm2, %v645_v1, 0.0 }
 0x14d   :  { %v975_v19 = vadd.f32 %v974_v8, %v973_v31  ;;  %v778_v53 = vadd.f32 %v777_v15, %v776_v14  ;;  %v856_v22 = vmul.f32 %v648_v5, %v648_v5  ;;  %v857_v34 = vmul.f32 %v2450_v62, %v2450_v62 }
 0x14e   :  { %1375 = vst.msk [vmem:[%s2518_s3 + $0xf4] sm:$0xf] %vm1313_vm1, %v1589_v21  ;;  %v978_v27 = vsel %vm659_vm2, %v855_v16, 0.0  ;;  %v781_v38 = vsel %vm659_vm2, %v648_v5, 0.0  ;;  %v783_v41 = vsel %vm659_vm2, %v2450_v62, 0.0  ;;  %v858_v42 = vmul.f32 %v656_v61, %v656_v61  ;;  %s1762_s3 = smov [#allocation2]  }
 0x14f   :  { %v780_v32 = vadd.f32 %v779_v28, %v778_v53  ;;  %v977_v33 = vadd.f32 %v976_v23, %v975_v19  ;;  %v980_v36 = vsel %vm659_vm2, %v856_v22, 0.0  ;;  %v982_v4 = vsel %vm659_vm2, %v857_v34, 0.0  ;;  %s1386_s22 = sshll.u32 %s1762_s3, 4  ;;  %s1387_s22 = int_to_ptr.vmem [resolvable:$true] %s1386_s22 }
 0x150   :  { %v785_v45 = vsel %vm659_vm2, %v656_v61, 0.0  ;;  %v984_v48 = vsel %vm659_vm2, %v858_v42, 0.0  ;;  %s1740_s23 = scalar_lea.vmem %s1387_s22, 32  ;;  %p1745_p1 = scmp.lt.s32.totalorder %s1387_s22, %s1387_s22 }
 0x151   :  { %v979_v39 = vadd.f32 %v978_v27, %v977_v33  ;;  %v782_v40 = vadd.f32 %v781_v38, %v780_v32  ;;  %p1741_p0 = scmp.ne.s32.totalorder %s1387_s22, %s1740_s23  ;;  %p1746_p2 = scmp.lt.s32.totalorder %s1740_s23, %s1740_s23 }
 0x153   :  { %v784_v58 = vadd.f32 %v783_v41, %v782_v40  ;;  %v981_v13 = vadd.f32 %v980_v36, %v979_v39  ;;  %p1747_p3 = por %p1746_p2, %p1745_p1 }
 0x155   :  { %v786_v25 = vadd.f32 %v785_v45, %v784_v58  ;;  %v983_v37 = vadd.f32 %v982_v4, %v981_v13  ;;  %p1748_p4 = pnand %p1747_p3, %p1741_p0 }
 0x157   :  { %v787_v50 = vrot.slane %v786_v25, 4  ;;  %v985_v18 = vadd.f32 %v984_v48, %v983_v37 }
 0x159   :  { %v788_v29 = vadd.f32 %v787_v50, %v786_v25  ;;  %v986_v47 = vrot.slane %v985_v18, 4 }
 0x15b   :  { %v789_v52 = vrot.slane %v788_v29, 2  ;;  %v987_v51 = vadd.f32 %v986_v47, %v985_v18 }
 0x15d   :  { %v790_v62 = vadd.f32 %v789_v52, %v788_v29  ;;  %v988_v54 = vrot.slane %v987_v51, 2 }
 0x15f   :  { %v791_v9 = vrot.slane %v790_v62, 1  ;;  %v989_v55 = vadd.f32 %v988_v54, %v987_v51 }
 0x161   :  { %v792_v24 = vadd.f32 %v791_v9, %v790_v62  ;;  %v990_v56 = vrot.slane %v989_v55, 1 }
 0x163   :  { %794 = vst.msk [vmem:[#allocation2] sm:$0x1] %vm793_vm3, %v792_v24  ;;  %v991_v59 = vadd.f32 %v990_v56, %v989_v55 }
 0x165   :  { %992 = vst.msk [vmem:[#allocation2 + $0x1] sm:$0x1] %vm793_vm3, %v991_v59 }
 0x166   :  { %1751 = shalt.err (!%p1748_p4)
}
 0x167   :  { %1389 = dma.vmem_to_hbm [thread:$0]  %s1387_s22, 32, %s2519_s4, [#allocation3]  }
 0x168   :  { %1760 = dma.done.wait [#allocation3], 32  }
 0x169   :  { %1761 = vsyncadd [#allocation3], 4294967264 }
 0x16a   :  { %1395 = vsyncpa [#allocation3], 1 }

</bundles_post_ra>
